<compile_context>
chip_gen: v7x
topology: tpu7x:2x2x1
jax: 0.10.0
libtpu: 0.0.40
codegen_flags: <defaults>
</compile_context>

<pallas_src>
import functools

import jax
import jax.numpy as jnp
from jax.experimental import pallas as pl
from jax.experimental.pallas import tpu as pltpu

# ---------------- synthetic "BERT" config (small shapes) ----------------
VOCAB = 100
HIDDEN = 32
N_LAYERS = 2
N_HEADS = 4
HEAD_DIM = HIDDEN // N_HEADS
INTERMEDIATE = 64
MAX_POS = 16
TYPE_VOCAB = 2
NUM_CLASSES = 4
PAD_ID = 0
LN_EPS = 1e-12


# ---------------- fused Pallas kernel ----------------
def _layer_norm(x, g, b):
    mean = jnp.mean(x, axis=-1, keepdims=True)
    var = jnp.mean((x - mean) ** 2, axis=-1, keepdims=True)
    return (x - mean) * jax.lax.rsqrt(var + LN_EPS) * g + b


def _bert_kernel(
    x_ref, bias_ref, sel_ref,
    eg_ref, eb_ref,
    wqkv_ref, bqkv_ref, wo_ref, bo_ref, ln1g_ref, ln1b_ref,
    w1_ref, b1_ref, w2_ref, b2_ref, ln2g_ref, ln2b_ref,
    wp_ref, bp_ref, wc_ref, bc_ref,
    o_cls_ref, o_logits_ref,
):
    f32 = jnp.float32
    scale = 1.0 / (HEAD_DIM ** 0.5)

    # Embedding LayerNorm (no residual; no zeros tensor needed).
    h = _layer_norm(x_ref[...], eg_ref[...], eb_ref[...])
    bias = bias_ref[...]          # [B*S, B*S] additive bias (padding + block-diag)

    for l in range(N_LAYERS):     # static unroll; everything stays on-chip
        # ---- fused QKV projection: one [B*S, H] x [H, 3H] MXU op ----
        qkv = jnp.dot(h, wqkv_ref[l], preferred_element_type=f32) + bqkv_ref[l]
        q = qkv[:, 0 * HIDDEN:1 * HIDDEN]
        k = qkv[:, 1 * HIDDEN:2 * HIDDEN]
        v = qkv[:, 2 * HIDDEN:3 * HIDDEN]

        # ---- multi-head attention on the [B*S, H] slab ----
        # Per-head static lane slices; the block-diagonal bias prevents
        # cross-batch attention; per-head output projections are summed so no
        # concatenation is needed.
        w_o = wo_ref[l]                              # [H, H]
        attn_out = bo_ref[l]                         # [1, H], broadcasts
        for hd in range(N_HEADS):
            lo, hi = hd * HEAD_DIM, (hd + 1) * HEAD_DIM
            qh, kh, vh = q[:, lo:hi], k[:, lo:hi], v[:, lo:hi]
            s = jax.lax.dot_general(
                qh, kh, (((1,), (1,)), ((), ())),
                preferred_element_type=f32) * scale + bias      # [B*S, B*S]
            m = jnp.max(s, axis=-1, keepdims=True)
            p = jnp.exp(s - m)
            inv = pl.reciprocal(jnp.sum(p, axis=-1, keepdims=True), approx=True)
            ctx_h = jnp.dot(p * inv, vh, preferred_element_type=f32)   # [B*S, D]
            attn_out = attn_out + jnp.dot(ctx_h, w_o[lo:hi, :],
                                          preferred_element_type=f32)

        # ---- residual + LayerNorm (fused epilogue) ----
        h = _layer_norm(attn_out + h, ln1g_ref[l], ln1b_ref[l])

        # ---- feed-forward + residual + LayerNorm ----
        # TODO(synk): HF/PyTorch BERT default GELU is the exact erf form; the
        # tanh approximation is used here for a guaranteed Mosaic lowering.
        ff = jnp.dot(h, w1_ref[l], preferred_element_type=f32) + b1_ref[l]
        ff = jax.nn.gelu(ff, approximate=True)
        ff = jnp.dot(ff, w2_ref[l], preferred_element_type=f32) + b2_ref[l]
        h = _layer_norm(ff + h, ln2g_ref[l], ln2b_ref[l])

    # ---- CLS rows via selection matmul, pooler (tanh), classifier ----
    cls = jnp.dot(sel_ref[...], h, preferred_element_type=f32)          # [B, H]
    pooled = jnp.tanh(jnp.dot(cls, wp_ref[...],
                              preferred_element_type=f32) + bp_ref[...])
    logits = jnp.dot(pooled, wc_ref[...],
                     preferred_element_type=f32) + bc_ref[...]

    o_cls_ref[...] = pooled.astype(o_cls_ref.dtype)
    o_logits_ref[...] = logits.astype(o_logits_ref.dtype)


def _full_spec(a):
    zeros = (0,) * a.ndim
    return pl.BlockSpec(a.shape, lambda zeros=zeros: zeros)


def bert_fused(x, bias_full, cls_sel, params):
    """x: [B*S, H], bias_full: [B*S, B*S], cls_sel: [B, B*S]."""
    B = cls_sel.shape[0]
    inputs = [
        x, bias_full, cls_sel,
        params["emb_ln_g"], params["emb_ln_b"],
        params["wqkv"], params["bqkv"], params["wo"], params["bo"],
        params["ln1_g"], params["ln1_b"],
        params["w1"], params["b1"], params["w2"], params["b2"],
        params["ln2_g"], params["ln2_b"],
        params["wp"], params["bp"], params["wc"], params["bc"],
    ]
    cls_out, logits = pl.pallas_call(
        _bert_kernel,
        out_shape=(jax.ShapeDtypeStruct((B, HIDDEN), jnp.float32),
                   jax.ShapeDtypeStruct((B, NUM_CLASSES), jnp.float32)),
        in_specs=[_full_spec(a) for a in inputs],
        out_specs=(pl.BlockSpec((B, HIDDEN), lambda: (0, 0)),
                   pl.BlockSpec((B, NUM_CLASSES), lambda: (0, 0))),
    )(*inputs)
    return cls_out, logits


# ---------------- deterministic parameter init (pre-packed layouts) ----------------
def init_params(key):
    scale = 0.02
    keys = iter(jax.random.split(key, 256))

    def nrm(shape):
        return scale * jax.random.normal(next(keys), shape, dtype=jnp.float32)

    def nrm_stack(shape):
        return jnp.stack([nrm(shape) for _ in range(N_LAYERS)])

    def zeros(*s):
        return jnp.zeros(s, jnp.float32)

    def ones(*s):
        return jnp.ones(s, jnp.float32)

    return {
        "word_emb": nrm((VOCAB, HIDDEN)),
        "pos_emb": nrm((MAX_POS, HIDDEN)),
        "type_emb": nrm((TYPE_VOCAB, HIDDEN)),
        "emb_ln_g": ones(1, HIDDEN),
        "emb_ln_b": zeros(1, HIDDEN),
        # per-layer params stacked on axis 0; Q/K/V fused on the output axis
        "wqkv": nrm_stack((HIDDEN, 3 * HIDDEN)),
        "bqkv": zeros(N_LAYERS, 1, 3 * HIDDEN),
        "wo": nrm_stack((HIDDEN, HIDDEN)),
        "bo": zeros(N_LAYERS, 1, HIDDEN),
        "ln1_g": ones(N_LAYERS, 1, HIDDEN),
        "ln1_b": zeros(N_LAYERS, 1, HIDDEN),
        "w1": nrm_stack((HIDDEN, INTERMEDIATE)),
        "b1": zeros(N_LAYERS, 1, INTERMEDIATE),
        "w2": nrm_stack((INTERMEDIATE, HIDDEN)),
        "b2": zeros(N_LAYERS, 1, HIDDEN),
        "ln2_g": ones(N_LAYERS, 1, HIDDEN),
        "ln2_b": zeros(N_LAYERS, 1, HIDDEN),
        "wp": nrm((HIDDEN, HIDDEN)),            # pooler
        "bp": zeros(1, HIDDEN),
        "wc": nrm((HIDDEN, NUM_CLASSES)),       # classifier (768 -> num_classes analog)
        "bc": zeros(1, NUM_CLASSES),
    }


# ---------------- model forward (matches Model.forward semantics) ----------------
@jax.jit
def model_forward(params, input_ids, token_type_ids=None, position_ids=None):
    B, S = input_ids.shape
    if token_type_ids is None:
        token_type_ids = jnp.zeros_like(input_ids)
    if position_ids is None:
        position_ids = jnp.broadcast_to(jnp.arange(S, dtype=jnp.int32), (B, S))

    # attention_mask = (input_ids != pad_token_id).float() -> additive bias,
    # plus a block-diagonal mask so flattened batches don't attend to each other.
    attn_mask = (input_ids != PAD_ID).astype(jnp.float32)            # [B, S]
    pad_bias = ((1.0 - attn_mask) * -10000.0).reshape(B * S)         # keys axis
    batch_ids = jnp.repeat(jnp.arange(B), S)
    same_batch = batch_ids[:, None] == batch_ids[None, :]
    bias_full = jnp.where(same_batch, pad_bias[None, :], -1e9).astype(jnp.float32)

    # CLS-row selection matrix (picks token 0 of each sequence inside the kernel).
    cls_sel = jnp.zeros((B, B * S), jnp.float32).at[
        jnp.arange(B), jnp.arange(B) * S].set(1.0)

    # embedding gathers are plain-JAX glue; everything else runs in one kernel
    emb = (params["word_emb"][input_ids]
           + params["pos_emb"][position_ids]
           + params["type_emb"][token_type_ids])                     # [B, S, H]
    x = emb.reshape(B * S, HIDDEN)

    cls_output, logits = bert_fused(x, bias_full, cls_sel, params)
    # torch.flatten(cls_output, 1) is a no-op on a 2-D tensor
    return cls_output, logits


if __name__ == "__main__":
    key = jax.random.PRNGKey(0)
    pkey, ikey = jax.random.split(key)
    params = init_params(pkey)

    B, S = 2, 8
    input_ids = jax.random.randint(ikey, (B, S), 0, VOCAB, dtype=jnp.int32)
    # force a couple of padding tokens so the attention mask does something
    input_ids = input_ids.at[0, -2:].set(PAD_ID)
    input_ids = input_ids.at[1, -1:].set(PAD_ID)

    cls_output, logits = model_forward(params, input_ids)
    jax.block_until_ready((cls_output, logits))
    assert cls_output.shape == (B, HIDDEN)
    assert logits.shape == (B, NUM_CLASSES)
    print("KERNEL_OK")
</pallas_src>

<mosaic_0001>
module attributes {stable_mosaic.version = 11 : i64} {
  func.func @_bert_kernel(%arg0: memref<16x32xf32, #tpu.memory_space<vmem>>, %arg1: memref<16x16xf32, #tpu.memory_space<vmem>>, %arg2: memref<2x16xf32, #tpu.memory_space<vmem>>, %arg3: memref<1x32xf32, #tpu.memory_space<vmem>>, %arg4: memref<1x32xf32, #tpu.memory_space<vmem>>, %arg5: memref<2x32x96xf32, #tpu.memory_space<vmem>>, %arg6: memref<2x1x96xf32, #tpu.memory_space<vmem>>, %arg7: memref<2x32x32xf32, #tpu.memory_space<vmem>>, %arg8: memref<2x1x32xf32, #tpu.memory_space<vmem>>, %arg9: memref<2x1x32xf32, #tpu.memory_space<vmem>>, %arg10: memref<2x1x32xf32, #tpu.memory_space<vmem>>, %arg11: memref<2x32x64xf32, #tpu.memory_space<vmem>>, %arg12: memref<2x1x64xf32, #tpu.memory_space<vmem>>, %arg13: memref<2x64x32xf32, #tpu.memory_space<vmem>>, %arg14: memref<2x1x32xf32, #tpu.memory_space<vmem>>, %arg15: memref<2x1x32xf32, #tpu.memory_space<vmem>>, %arg16: memref<2x1x32xf32, #tpu.memory_space<vmem>>, %arg17: memref<32x32xf32, #tpu.memory_space<vmem>>, %arg18: memref<1x32xf32, #tpu.memory_space<vmem>>, %arg19: memref<32x4xf32, #tpu.memory_space<vmem>>, %arg20: memref<1x4xf32, #tpu.memory_space<vmem>>, %arg21: memref<2x32xf32, #tpu.memory_space<vmem>>, %arg22: memref<2x4xf32, #tpu.memory_space<vmem>>) attributes {dimension_semantics = [], scalar_prefetch = 0 : i64, scratch_operands = 0 : i64, tpu.core_type = #tpu.core_type<tc>} {
    %c0 = arith.constant 0 : index
    %c0_0 = arith.constant 0 : index
    %0 = vector.load %arg0[%c0, %c0_0] : memref<16x32xf32, #tpu.memory_space<vmem>>, vector<16x32xf32>
    %c0_1 = arith.constant 0 : index
    %c0_2 = arith.constant 0 : index
    %1 = vector.load %arg3[%c0_1, %c0_2] : memref<1x32xf32, #tpu.memory_space<vmem>>, vector<1x32xf32>
    %c0_3 = arith.constant 0 : index
    %c0_4 = arith.constant 0 : index
    %2 = vector.load %arg4[%c0_3, %c0_4] : memref<1x32xf32, #tpu.memory_space<vmem>>, vector<1x32xf32>
    %cst = arith.constant dense<0.000000e+00> : vector<16xf32>
    %3 = vector.multi_reduction <add>, %0, %cst [1] : vector<16x32xf32> to vector<16xf32>
    %4 = vector.shape_cast %3 : vector<16xf32> to vector<16x1xf32>
    %cst_5 = arith.constant 3.200000e+01 : f32
    %5 = vector.broadcast %cst_5 : f32 to vector<16x1xf32>
    %6 = arith.divf %4, %5 : vector<16x1xf32>
    %7 = vector.broadcast %6 : vector<16x1xf32> to vector<16x32xf32>
    %8 = arith.subf %0, %7 : vector<16x32xf32>
    %9 = arith.mulf %8, %8 : vector<16x32xf32>
    %cst_6 = arith.constant dense<0.000000e+00> : vector<16xf32>
    %10 = vector.multi_reduction <add>, %9, %cst_6 [1] : vector<16x32xf32> to vector<16xf32>
    %11 = vector.shape_cast %10 : vector<16xf32> to vector<16x1xf32>
    %cst_7 = arith.constant 3.200000e+01 : f32
    %12 = vector.broadcast %cst_7 : f32 to vector<16x1xf32>
    %13 = arith.divf %11, %12 : vector<16x1xf32>
    %14 = vector.broadcast %6 : vector<16x1xf32> to vector<16x32xf32>
    %15 = arith.subf %0, %14 : vector<16x32xf32>
    %cst_8 = arith.constant 9.99999996E-13 : f32
    %16 = vector.broadcast %cst_8 : f32 to vector<16x1xf32>
    %17 = arith.addf %13, %16 : vector<16x1xf32>
    %18 = math.rsqrt %17 : vector<16x1xf32>
    %19 = vector.broadcast %18 : vector<16x1xf32> to vector<16x32xf32>
    %20 = arith.mulf %15, %19 : vector<16x32xf32>
    %21 = vector.broadcast %1 : vector<1x32xf32> to vector<16x32xf32>
    %22 = arith.mulf %20, %21 : vector<16x32xf32>
    %23 = vector.broadcast %2 : vector<1x32xf32> to vector<16x32xf32>
    %24 = arith.addf %22, %23 : vector<16x32xf32>
    %c0_9 = arith.constant 0 : index
    %c0_10 = arith.constant 0 : index
    %25 = vector.load %arg1[%c0_9, %c0_10] : memref<16x16xf32, #tpu.memory_space<vmem>>, vector<16x16xf32>
    %c0_11 = arith.constant 0 : index
    %c0_12 = arith.constant 0 : index
    %c0_13 = arith.constant 0 : index
    %26 = vector.load %arg5[%c0_11, %c0_12, %c0_13] : memref<2x32x96xf32, #tpu.memory_space<vmem>>, vector<1x32x96xf32>
    %27 = vector.shape_cast %26 : vector<1x32x96xf32> to vector<32x96xf32>
    %cst_14 = arith.constant dense<0.000000e+00> : vector<16x96xf32>
    %28 = tpu.matmul %24, %27, %cst_14 {dimension_numbers = #tpu.dot_dimension_numbers<[1], [0], [0], [1], [0, 0, 1, 1], [], []>} : vector<16x32xf32>, vector<32x96xf32>, vector<16x96xf32> -> vector<16x96xf32>
    %c0_15 = arith.constant 0 : index
    %c0_16 = arith.constant 0 : index
    %c0_17 = arith.constant 0 : index
    %29 = vector.load %arg6[%c0_15, %c0_16, %c0_17] : memref<2x1x96xf32, #tpu.memory_space<vmem>>, vector<1x1x96xf32>
    %30 = vector.shape_cast %29 : vector<1x1x96xf32> to vector<1x96xf32>
    %31 = vector.broadcast %30 : vector<1x96xf32> to vector<16x96xf32>
    %32 = arith.addf %28, %31 : vector<16x96xf32>
    %33 = vector.extract_strided_slice %32 {offsets = [0, 0], sizes = [16, 32], strides = [1, 1]} : vector<16x96xf32> to vector<16x32xf32>
    %34 = vector.extract_strided_slice %32 {offsets = [0, 32], sizes = [16, 32], strides = [1, 1]} : vector<16x96xf32> to vector<16x32xf32>
    %35 = vector.extract_strided_slice %32 {offsets = [0, 64], sizes = [16, 32], strides = [1, 1]} : vector<16x96xf32> to vector<16x32xf32>
    %c0_18 = arith.constant 0 : index
    %c0_19 = arith.constant 0 : index
    %c0_20 = arith.constant 0 : index
    %36 = vector.load %arg7[%c0_18, %c0_19, %c0_20] : memref<2x32x32xf32, #tpu.memory_space<vmem>>, vector<1x32x32xf32>
    %37 = vector.shape_cast %36 : vector<1x32x32xf32> to vector<32x32xf32>
    %c0_21 = arith.constant 0 : index
    %c0_22 = arith.constant 0 : index
    %c0_23 = arith.constant 0 : index
    %38 = vector.load %arg8[%c0_21, %c0_22, %c0_23] : memref<2x1x32xf32, #tpu.memory_space<vmem>>, vector<1x1x32xf32>
    %39 = vector.shape_cast %38 : vector<1x1x32xf32> to vector<1x32xf32>
    %40 = vector.extract_strided_slice %33 {offsets = [0, 0], sizes = [16, 8], strides = [1, 1]} : vector<16x32xf32> to vector<16x8xf32>
    %41 = vector.extract_strided_slice %34 {offsets = [0, 0], sizes = [16, 8], strides = [1, 1]} : vector<16x32xf32> to vector<16x8xf32>
    %42 = vector.extract_strided_slice %35 {offsets = [0, 0], sizes = [16, 8], strides = [1, 1]} : vector<16x32xf32> to vector<16x8xf32>
    %cst_24 = arith.constant dense<0.000000e+00> : vector<16x16xf32>
    %43 = tpu.matmul %40, %41, %cst_24 {dimension_numbers = #tpu.dot_dimension_numbers<[1], [1], [0], [0], [0, 0, 1, 0], [], []>} : vector<16x8xf32>, vector<16x8xf32>, vector<16x16xf32> -> vector<16x16xf32>
    %cst_25 = arith.constant 0.353553385 : f32
    %44 = vector.broadcast %cst_25 : f32 to vector<16x16xf32>
    %45 = arith.mulf %43, %44 : vector<16x16xf32>
    %46 = arith.addf %45, %25 : vector<16x16xf32>
    %cst_26 = arith.constant dense<0xFF800000> : vector<16xf32>
    %47 = vector.multi_reduction <maximumf>, %46, %cst_26 [1] : vector<16x16xf32> to vector<16xf32>
    %48 = vector.shape_cast %47 : vector<16xf32> to vector<16x1xf32>
    %49 = vector.broadcast %48 : vector<16x1xf32> to vector<16x16xf32>
    %50 = arith.subf %46, %49 : vector<16x16xf32>
    %51 = math.exp %50 : vector<16x16xf32>
    %cst_27 = arith.constant dense<0.000000e+00> : vector<16xf32>
    %52 = vector.multi_reduction <add>, %51, %cst_27 [1] : vector<16x16xf32> to vector<16xf32>
    %53 = vector.shape_cast %52 : vector<16xf32> to vector<16x1xf32>
    %54 = tpu.reciprocal %53 {approx = true} : vector<16x1xf32> -> vector<16x1xf32>
    %55 = vector.broadcast %54 : vector<16x1xf32> to vector<16x16xf32>
    %56 = arith.mulf %51, %55 : vector<16x16xf32>
    %cst_28 = arith.constant dense<0.000000e+00> : vector<16x8xf32>
    %57 = tpu.matmul %56, %42, %cst_28 {dimension_numbers = #tpu.dot_dimension_numbers<[1], [0], [0], [1], [0, 0, 1, 1], [], []>} : vector<16x16xf32>, vector<16x8xf32>, vector<16x8xf32> -> vector<16x8xf32>
    %58 = vector.extract_strided_slice %37 {offsets = [0, 0], sizes = [8, 32], strides = [1, 1]} : vector<32x32xf32> to vector<8x32xf32>
    %cst_29 = arith.constant dense<0.000000e+00> : vector<16x32xf32>
    %59 = tpu.matmul %57, %58, %cst_29 {dimension_numbers = #tpu.dot_dimension_numbers<[1], [0], [0], [1], [0, 0, 1, 1], [], []>} : vector<16x8xf32>, vector<8x32xf32>, vector<16x32xf32> -> vector<16x32xf32>
    %60 = vector.broadcast %39 : vector<1x32xf32> to vector<16x32xf32>
    %61 = arith.addf %60, %59 : vector<16x32xf32>
    %62 = vector.extract_strided_slice %33 {offsets = [0, 8], sizes = [16, 8], strides = [1, 1]} : vector<16x32xf32> to vector<16x8xf32>
    %63 = vector.extract_strided_slice %34 {offsets = [0, 8], sizes = [16, 8], strides = [1, 1]} : vector<16x32xf32> to vector<16x8xf32>
    %64 = vector.extract_strided_slice %35 {offsets = [0, 8], sizes = [16, 8], strides = [1, 1]} : vector<16x32xf32> to vector<16x8xf32>
    %cst_30 = arith.constant dense<0.000000e+00> : vector<16x16xf32>
    %65 = tpu.matmul %62, %63, %cst_30 {dimension_numbers = #tpu.dot_dimension_numbers<[1], [1], [0], [0], [0, 0, 1, 0], [], []>} : vector<16x8xf32>, vector<16x8xf32>, vector<16x16xf32> -> vector<16x16xf32>
    %cst_31 = arith.constant 0.353553385 : f32
    %66 = vector.broadcast %cst_31 : f32 to vector<16x16xf32>
    %67 = arith.mulf %65, %66 : vector<16x16xf32>
    %68 = arith.addf %67, %25 : vector<16x16xf32>
    %cst_32 = arith.constant dense<0xFF800000> : vector<16xf32>
    %69 = vector.multi_reduction <maximumf>, %68, %cst_32 [1] : vector<16x16xf32> to vector<16xf32>
    %70 = vector.shape_cast %69 : vector<16xf32> to vector<16x1xf32>
    %71 = vector.broadcast %70 : vector<16x1xf32> to vector<16x16xf32>
    %72 = arith.subf %68, %71 : vector<16x16xf32>
    %73 = math.exp %72 : vector<16x16xf32>
    %cst_33 = arith.constant dense<0.000000e+00> : vector<16xf32>
    %74 = vector.multi_reduction <add>, %73, %cst_33 [1] : vector<16x16xf32> to vector<16xf32>
    %75 = vector.shape_cast %74 : vector<16xf32> to vector<16x1xf32>
    %76 = tpu.reciprocal %75 {approx = true} : vector<16x1xf32> -> vector<16x1xf32>
    %77 = vector.broadcast %76 : vector<16x1xf32> to vector<16x16xf32>
    %78 = arith.mulf %73, %77 : vector<16x16xf32>
    %cst_34 = arith.constant dense<0.000000e+00> : vector<16x8xf32>
    %79 = tpu.matmul %78, %64, %cst_34 {dimension_numbers = #tpu.dot_dimension_numbers<[1], [0], [0], [1], [0, 0, 1, 1], [], []>} : vector<16x16xf32>, vector<16x8xf32>, vector<16x8xf32> -> vector<16x8xf32>
    %80 = vector.extract_strided_slice %37 {offsets = [8, 0], sizes = [8, 32], strides = [1, 1]} : vector<32x32xf32> to vector<8x32xf32>
    %cst_35 = arith.constant dense<0.000000e+00> : vector<16x32xf32>
    %81 = tpu.matmul %79, %80, %cst_35 {dimension_numbers = #tpu.dot_dimension_numbers<[1], [0], [0], [1], [0, 0, 1, 1], [], []>} : vector<16x8xf32>, vector<8x32xf32>, vector<16x32xf32> -> vector<16x32xf32>
    %82 = arith.addf %61, %81 : vector<16x32xf32>
    %83 = vector.extract_strided_slice %33 {offsets = [0, 16], sizes = [16, 8], strides = [1, 1]} : vector<16x32xf32> to vector<16x8xf32>
    %84 = vector.extract_strided_slice %34 {offsets = [0, 16], sizes = [16, 8], strides = [1, 1]} : vector<16x32xf32> to vector<16x8xf32>
    %85 = vector.extract_strided_slice %35 {offsets = [0, 16], sizes = [16, 8], strides = [1, 1]} : vector<16x32xf32> to vector<16x8xf32>
    %cst_36 = arith.constant dense<0.000000e+00> : vector<16x16xf32>
    %86 = tpu.matmul %83, %84, %cst_36 {dimension_numbers = #tpu.dot_dimension_numbers<[1], [1], [0], [0], [0, 0, 1, 0], [], []>} : vector<16x8xf32>, vector<16x8xf32>, vector<16x16xf32> -> vector<16x16xf32>
    %cst_37 = arith.constant 0.353553385 : f32
    %87 = vector.broadcast %cst_37 : f32 to vector<16x16xf32>
    %88 = arith.mulf %86, %87 : vector<16x16xf32>
    %89 = arith.addf %88, %25 : vector<16x16xf32>
    %cst_38 = arith.constant dense<0xFF800000> : vector<16xf32>
    %90 = vector.multi_reduction <maximumf>, %89, %cst_38 [1] : vector<16x16xf32> to vector<16xf32>
    %91 = vector.shape_cast %90 : vector<16xf32> to vector<16x1xf32>
    %92 = vector.broadcast %91 : vector<16x1xf32> to vector<16x16xf32>
    %93 = arith.subf %89, %92 : vector<16x16xf32>
    %94 = math.exp %93 : vector<16x16xf32>
    %cst_39 = arith.constant dense<0.000000e+00> : vector<16xf32>
    %95 = vector.multi_reduction <add>, %94, %cst_39 [1] : vector<16x16xf32> to vector<16xf32>
    %96 = vector.shape_cast %95 : vector<16xf32> to vector<16x1xf32>
    %97 = tpu.reciprocal %96 {approx = true} : vector<16x1xf32> -> vector<16x1xf32>
    %98 = vector.broadcast %97 : vector<16x1xf32> to vector<16x16xf32>
    %99 = arith.mulf %94, %98 : vector<16x16xf32>
    %cst_40 = arith.constant dense<0.000000e+00> : vector<16x8xf32>
    %100 = tpu.matmul %99, %85, %cst_40 {dimension_numbers = #tpu.dot_dimension_numbers<[1], [0], [0], [1], [0, 0, 1, 1], [], []>} : vector<16x16xf32>, vector<16x8xf32>, vector<16x8xf32> -> vector<16x8xf32>
    %101 = vector.extract_strided_slice %37 {offsets = [16, 0], sizes = [8, 32], strides = [1, 1]} : vector<32x32xf32> to vector<8x32xf32>
    %cst_41 = arith.constant dense<0.000000e+00> : vector<16x32xf32>
    %102 = tpu.matmul %100, %101, %cst_41 {dimension_numbers = #tpu.dot_dimension_numbers<[1], [0], [0], [1], [0, 0, 1, 1], [], []>} : vector<16x8xf32>, vector<8x32xf32>, vector<16x32xf32> -> vector<16x32xf32>
    %103 = arith.addf %82, %102 : vector<16x32xf32>
    %104 = vector.extract_strided_slice %33 {offsets = [0, 24], sizes = [16, 8], strides = [1, 1]} : vector<16x32xf32> to vector<16x8xf32>
    %105 = vector.extract_strided_slice %34 {offsets = [0, 24], sizes = [16, 8], strides = [1, 1]} : vector<16x32xf32> to vector<16x8xf32>
    %106 = vector.extract_strided_slice %35 {offsets = [0, 24], sizes = [16, 8], strides = [1, 1]} : vector<16x32xf32> to vector<16x8xf32>
    %cst_42 = arith.constant dense<0.000000e+00> : vector<16x16xf32>
    %107 = tpu.matmul %104, %105, %cst_42 {dimension_numbers = #tpu.dot_dimension_numbers<[1], [1], [0], [0], [0, 0, 1, 0], [], []>} : vector<16x8xf32>, vector<16x8xf32>, vector<16x16xf32> -> vector<16x16xf32>
    %cst_43 = arith.constant 0.353553385 : f32
    %108 = vector.broadcast %cst_43 : f32 to vector<16x16xf32>
    %109 = arith.mulf %107, %108 : vector<16x16xf32>
    %110 = arith.addf %109, %25 : vector<16x16xf32>
    %cst_44 = arith.constant dense<0xFF800000> : vector<16xf32>
    %111 = vector.multi_reduction <maximumf>, %110, %cst_44 [1] : vector<16x16xf32> to vector<16xf32>
    %112 = vector.shape_cast %111 : vector<16xf32> to vector<16x1xf32>
    %113 = vector.broadcast %112 : vector<16x1xf32> to vector<16x16xf32>
    %114 = arith.subf %110, %113 : vector<16x16xf32>
    %115 = math.exp %114 : vector<16x16xf32>
    %cst_45 = arith.constant dense<0.000000e+00> : vector<16xf32>
    %116 = vector.multi_reduction <add>, %115, %cst_45 [1] : vector<16x16xf32> to vector<16xf32>
    %117 = vector.shape_cast %116 : vector<16xf32> to vector<16x1xf32>
    %118 = tpu.reciprocal %117 {approx = true} : vector<16x1xf32> -> vector<16x1xf32>
    %119 = vector.broadcast %118 : vector<16x1xf32> to vector<16x16xf32>
    %120 = arith.mulf %115, %119 : vector<16x16xf32>
    %cst_46 = arith.constant dense<0.000000e+00> : vector<16x8xf32>
    %121 = tpu.matmul %120, %106, %cst_46 {dimension_numbers = #tpu.dot_dimension_numbers<[1], [0], [0], [1], [0, 0, 1, 1], [], []>} : vector<16x16xf32>, vector<16x8xf32>, vector<16x8xf32> -> vector<16x8xf32>
    %122 = vector.extract_strided_slice %37 {offsets = [24, 0], sizes = [8, 32], strides = [1, 1]} : vector<32x32xf32> to vector<8x32xf32>
    %cst_47 = arith.constant dense<0.000000e+00> : vector<16x32xf32>
    %123 = tpu.matmul %121, %122, %cst_47 {dimension_numbers = #tpu.dot_dimension_numbers<[1], [0], [0], [1], [0, 0, 1, 1], [], []>} : vector<16x8xf32>, vector<8x32xf32>, vector<16x32xf32> -> vector<16x32xf32>
    %124 = arith.addf %103, %123 : vector<16x32xf32>
    %125 = arith.addf %124, %24 : vector<16x32xf32>
    %c0_48 = arith.constant 0 : index
    %c0_49 = arith.constant 0 : index
    %c0_50 = arith.constant 0 : index
    %126 = vector.load %arg9[%c0_48, %c0_49, %c0_50] : memref<2x1x32xf32, #tpu.memory_space<vmem>>, vector<1x1x32xf32>
    %127 = vector.shape_cast %126 : vector<1x1x32xf32> to vector<1x32xf32>
    %c0_51 = arith.constant 0 : index
    %c0_52 = arith.constant 0 : index
    %c0_53 = arith.constant 0 : index
    %128 = vector.load %arg10[%c0_51, %c0_52, %c0_53] : memref<2x1x32xf32, #tpu.memory_space<vmem>>, vector<1x1x32xf32>
    %129 = vector.shape_cast %128 : vector<1x1x32xf32> to vector<1x32xf32>
    %cst_54 = arith.constant dense<0.000000e+00> : vector<16xf32>
    %130 = vector.multi_reduction <add>, %125, %cst_54 [1] : vector<16x32xf32> to vector<16xf32>
    %131 = vector.shape_cast %130 : vector<16xf32> to vector<16x1xf32>
    %cst_55 = arith.constant 3.200000e+01 : f32
    %132 = vector.broadcast %cst_55 : f32 to vector<16x1xf32>
    %133 = arith.divf %131, %132 : vector<16x1xf32>
    %134 = vector.broadcast %133 : vector<16x1xf32> to vector<16x32xf32>
    %135 = arith.subf %125, %134 : vector<16x32xf32>
    %136 = arith.mulf %135, %135 : vector<16x32xf32>
    %cst_56 = arith.constant dense<0.000000e+00> : vector<16xf32>
    %137 = vector.multi_reduction <add>, %136, %cst_56 [1] : vector<16x32xf32> to vector<16xf32>
    %138 = vector.shape_cast %137 : vector<16xf32> to vector<16x1xf32>
    %cst_57 = arith.constant 3.200000e+01 : f32
    %139 = vector.broadcast %cst_57 : f32 to vector<16x1xf32>
    %140 = arith.divf %138, %139 : vector<16x1xf32>
    %141 = vector.broadcast %133 : vector<16x1xf32> to vector<16x32xf32>
    %142 = arith.subf %125, %141 : vector<16x32xf32>
    %cst_58 = arith.constant 9.99999996E-13 : f32
    %143 = vector.broadcast %cst_58 : f32 to vector<16x1xf32>
    %144 = arith.addf %140, %143 : vector<16x1xf32>
    %145 = math.rsqrt %144 : vector<16x1xf32>
    %146 = vector.broadcast %145 : vector<16x1xf32> to vector<16x32xf32>
    %147 = arith.mulf %142, %146 : vector<16x32xf32>
    %148 = vector.broadcast %127 : vector<1x32xf32> to vector<16x32xf32>
    %149 = arith.mulf %147, %148 : vector<16x32xf32>
    %150 = vector.broadcast %129 : vector<1x32xf32> to vector<16x32xf32>
    %151 = arith.addf %149, %150 : vector<16x32xf32>
    %c0_59 = arith.constant 0 : index
    %c0_60 = arith.constant 0 : index
    %c0_61 = arith.constant 0 : index
    %152 = vector.load %arg11[%c0_59, %c0_60, %c0_61] : memref<2x32x64xf32, #tpu.memory_space<vmem>>, vector<1x32x64xf32>
    %153 = vector.shape_cast %152 : vector<1x32x64xf32> to vector<32x64xf32>
    %cst_62 = arith.constant dense<0.000000e+00> : vector<16x64xf32>
    %154 = tpu.matmul %151, %153, %cst_62 {dimension_numbers = #tpu.dot_dimension_numbers<[1], [0], [0], [1], [0, 0, 1, 1], [], []>} : vector<16x32xf32>, vector<32x64xf32>, vector<16x64xf32> -> vector<16x64xf32>
    %c0_63 = arith.constant 0 : index
    %c0_64 = arith.constant 0 : index
    %c0_65 = arith.constant 0 : index
    %155 = vector.load %arg12[%c0_63, %c0_64, %c0_65] : memref<2x1x64xf32, #tpu.memory_space<vmem>>, vector<1x1x64xf32>
    %156 = vector.shape_cast %155 : vector<1x1x64xf32> to vector<1x64xf32>
    %157 = vector.broadcast %156 : vector<1x64xf32> to vector<16x64xf32>
    %158 = arith.addf %154, %157 : vector<16x64xf32>
    %159 = arith.mulf %158, %158 : vector<16x64xf32>
    %160 = arith.mulf %158, %159 : vector<16x64xf32>
    %cst_66 = arith.constant 4.471500e-02 : f32
    %161 = vector.broadcast %cst_66 : f32 to vector<16x64xf32>
    %162 = arith.mulf %161, %160 : vector<16x64xf32>
    %163 = arith.addf %158, %162 : vector<16x64xf32>
    %cst_67 = arith.constant 0.797884583 : f32
    %164 = vector.broadcast %cst_67 : f32 to vector<16x64xf32>
    %165 = arith.mulf %164, %163 : vector<16x64xf32>
    %166 = math.tanh %165 : vector<16x64xf32>
    %cst_68 = arith.constant 1.000000e+00 : f32
    %167 = vector.broadcast %cst_68 : f32 to vector<16x64xf32>
    %168 = arith.addf %167, %166 : vector<16x64xf32>
    %cst_69 = arith.constant 5.000000e-01 : f32
    %169 = vector.broadcast %cst_69 : f32 to vector<16x64xf32>
    %170 = arith.mulf %169, %168 : vector<16x64xf32>
    %171 = arith.mulf %158, %170 : vector<16x64xf32>
    %c0_70 = arith.constant 0 : index
    %c0_71 = arith.constant 0 : index
    %c0_72 = arith.constant 0 : index
    %172 = vector.load %arg13[%c0_70, %c0_71, %c0_72] : memref<2x64x32xf32, #tpu.memory_space<vmem>>, vector<1x64x32xf32>
    %173 = vector.shape_cast %172 : vector<1x64x32xf32> to vector<64x32xf32>
    %cst_73 = arith.constant dense<0.000000e+00> : vector<16x32xf32>
    %174 = tpu.matmul %171, %173, %cst_73 {dimension_numbers = #tpu.dot_dimension_numbers<[1], [0], [0], [1], [0, 0, 1, 1], [], []>} : vector<16x64xf32>, vector<64x32xf32>, vector<16x32xf32> -> vector<16x32xf32>
    %c0_74 = arith.constant 0 : index
    %c0_75 = arith.constant 0 : index
    %c0_76 = arith.constant 0 : index
    %175 = vector.load %arg14[%c0_74, %c0_75, %c0_76] : memref<2x1x32xf32, #tpu.memory_space<vmem>>, vector<1x1x32xf32>
    %176 = vector.shape_cast %175 : vector<1x1x32xf32> to vector<1x32xf32>
    %177 = vector.broadcast %176 : vector<1x32xf32> to vector<16x32xf32>
    %178 = arith.addf %174, %177 : vector<16x32xf32>
    %179 = arith.addf %178, %151 : vector<16x32xf32>
    %c0_77 = arith.constant 0 : index
    %c0_78 = arith.constant 0 : index
    %c0_79 = arith.constant 0 : index
    %180 = vector.load %arg15[%c0_77, %c0_78, %c0_79] : memref<2x1x32xf32, #tpu.memory_space<vmem>>, vector<1x1x32xf32>
    %181 = vector.shape_cast %180 : vector<1x1x32xf32> to vector<1x32xf32>
    %c0_80 = arith.constant 0 : index
    %c0_81 = arith.constant 0 : index
    %c0_82 = arith.constant 0 : index
    %182 = vector.load %arg16[%c0_80, %c0_81, %c0_82] : memref<2x1x32xf32, #tpu.memory_space<vmem>>, vector<1x1x32xf32>
    %183 = vector.shape_cast %182 : vector<1x1x32xf32> to vector<1x32xf32>
    %cst_83 = arith.constant dense<0.000000e+00> : vector<16xf32>
    %184 = vector.multi_reduction <add>, %179, %cst_83 [1] : vector<16x32xf32> to vector<16xf32>
    %185 = vector.shape_cast %184 : vector<16xf32> to vector<16x1xf32>
    %cst_84 = arith.constant 3.200000e+01 : f32
    %186 = vector.broadcast %cst_84 : f32 to vector<16x1xf32>
    %187 = arith.divf %185, %186 : vector<16x1xf32>
    %188 = vector.broadcast %187 : vector<16x1xf32> to vector<16x32xf32>
    %189 = arith.subf %179, %188 : vector<16x32xf32>
    %190 = arith.mulf %189, %189 : vector<16x32xf32>
    %cst_85 = arith.constant dense<0.000000e+00> : vector<16xf32>
    %191 = vector.multi_reduction <add>, %190, %cst_85 [1] : vector<16x32xf32> to vector<16xf32>
    %192 = vector.shape_cast %191 : vector<16xf32> to vector<16x1xf32>
    %cst_86 = arith.constant 3.200000e+01 : f32
    %193 = vector.broadcast %cst_86 : f32 to vector<16x1xf32>
    %194 = arith.divf %192, %193 : vector<16x1xf32>
    %195 = vector.broadcast %187 : vector<16x1xf32> to vector<16x32xf32>
    %196 = arith.subf %179, %195 : vector<16x32xf32>
    %cst_87 = arith.constant 9.99999996E-13 : f32
    %197 = vector.broadcast %cst_87 : f32 to vector<16x1xf32>
    %198 = arith.addf %194, %197 : vector<16x1xf32>
    %199 = math.rsqrt %198 : vector<16x1xf32>
    %200 = vector.broadcast %199 : vector<16x1xf32> to vector<16x32xf32>
    %201 = arith.mulf %196, %200 : vector<16x32xf32>
    %202 = vector.broadcast %181 : vector<1x32xf32> to vector<16x32xf32>
    %203 = arith.mulf %201, %202 : vector<16x32xf32>
    %204 = vector.broadcast %183 : vector<1x32xf32> to vector<16x32xf32>
    %205 = arith.addf %203, %204 : vector<16x32xf32>
    %c1 = arith.constant 1 : index
    %c0_88 = arith.constant 0 : index
    %c0_89 = arith.constant 0 : index
    %206 = vector.load %arg5[%c1, %c0_88, %c0_89] : memref<2x32x96xf32, #tpu.memory_space<vmem>>, vector<1x32x96xf32>
    %207 = vector.shape_cast %206 : vector<1x32x96xf32> to vector<32x96xf32>
    %cst_90 = arith.constant dense<0.000000e+00> : vector<16x96xf32>
    %208 = tpu.matmul %205, %207, %cst_90 {dimension_numbers = #tpu.dot_dimension_numbers<[1], [0], [0], [1], [0, 0, 1, 1], [], []>} : vector<16x32xf32>, vector<32x96xf32>, vector<16x96xf32> -> vector<16x96xf32>
    %c1_91 = arith.constant 1 : index
    %c0_92 = arith.constant 0 : index
    %c0_93 = arith.constant 0 : index
    %209 = vector.load %arg6[%c1_91, %c0_92, %c0_93] : memref<2x1x96xf32, #tpu.memory_space<vmem>>, vector<1x1x96xf32>
    %210 = vector.shape_cast %209 : vector<1x1x96xf32> to vector<1x96xf32>
    %211 = vector.broadcast %210 : vector<1x96xf32> to vector<16x96xf32>
    %212 = arith.addf %208, %211 : vector<16x96xf32>
    %213 = vector.extract_strided_slice %212 {offsets = [0, 0], sizes = [16, 32], strides = [1, 1]} : vector<16x96xf32> to vector<16x32xf32>
    %214 = vector.extract_strided_slice %212 {offsets = [0, 32], sizes = [16, 32], strides = [1, 1]} : vector<16x96xf32> to vector<16x32xf32>
    %215 = vector.extract_strided_slice %212 {offsets = [0, 64], sizes = [16, 32], strides = [1, 1]} : vector<16x96xf32> to vector<16x32xf32>
    %c1_94 = arith.constant 1 : index
    %c0_95 = arith.constant 0 : index
    %c0_96 = arith.constant 0 : index
    %216 = vector.load %arg7[%c1_94, %c0_95, %c0_96] : memref<2x32x32xf32, #tpu.memory_space<vmem>>, vector<1x32x32xf32>
    %217 = vector.shape_cast %216 : vector<1x32x32xf32> to vector<32x32xf32>
    %c1_97 = arith.constant 1 : index
    %c0_98 = arith.constant 0 : index
    %c0_99 = arith.constant 0 : index
    %218 = vector.load %arg8[%c1_97, %c0_98, %c0_99] : memref<2x1x32xf32, #tpu.memory_space<vmem>>, vector<1x1x32xf32>
    %219 = vector.shape_cast %218 : vector<1x1x32xf32> to vector<1x32xf32>
    %220 = vector.extract_strided_slice %213 {offsets = [0, 0], sizes = [16, 8], strides = [1, 1]} : vector<16x32xf32> to vector<16x8xf32>
    %221 = vector.extract_strided_slice %214 {offsets = [0, 0], sizes = [16, 8], strides = [1, 1]} : vector<16x32xf32> to vector<16x8xf32>
    %222 = vector.extract_strided_slice %215 {offsets = [0, 0], sizes = [16, 8], strides = [1, 1]} : vector<16x32xf32> to vector<16x8xf32>
    %cst_100 = arith.constant dense<0.000000e+00> : vector<16x16xf32>
    %223 = tpu.matmul %220, %221, %cst_100 {dimension_numbers = #tpu.dot_dimension_numbers<[1], [1], [0], [0], [0, 0, 1, 0], [], []>} : vector<16x8xf32>, vector<16x8xf32>, vector<16x16xf32> -> vector<16x16xf32>
    %cst_101 = arith.constant 0.353553385 : f32
    %224 = vector.broadcast %cst_101 : f32 to vector<16x16xf32>
    %225 = arith.mulf %223, %224 : vector<16x16xf32>
    %226 = arith.addf %225, %25 : vector<16x16xf32>
    %cst_102 = arith.constant dense<0xFF800000> : vector<16xf32>
    %227 = vector.multi_reduction <maximumf>, %226, %cst_102 [1] : vector<16x16xf32> to vector<16xf32>
    %228 = vector.shape_cast %227 : vector<16xf32> to vector<16x1xf32>
    %229 = vector.broadcast %228 : vector<16x1xf32> to vector<16x16xf32>
    %230 = arith.subf %226, %229 : vector<16x16xf32>
    %231 = math.exp %230 : vector<16x16xf32>
    %cst_103 = arith.constant dense<0.000000e+00> : vector<16xf32>
    %232 = vector.multi_reduction <add>, %231, %cst_103 [1] : vector<16x16xf32> to vector<16xf32>
    %233 = vector.shape_cast %232 : vector<16xf32> to vector<16x1xf32>
    %234 = tpu.reciprocal %233 {approx = true} : vector<16x1xf32> -> vector<16x1xf32>
    %235 = vector.broadcast %234 : vector<16x1xf32> to vector<16x16xf32>
    %236 = arith.mulf %231, %235 : vector<16x16xf32>
    %cst_104 = arith.constant dense<0.000000e+00> : vector<16x8xf32>
    %237 = tpu.matmul %236, %222, %cst_104 {dimension_numbers = #tpu.dot_dimension_numbers<[1], [0], [0], [1], [0, 0, 1, 1], [], []>} : vector<16x16xf32>, vector<16x8xf32>, vector<16x8xf32> -> vector<16x8xf32>
    %238 = vector.extract_strided_slice %217 {offsets = [0, 0], sizes = [8, 32], strides = [1, 1]} : vector<32x32xf32> to vector<8x32xf32>
    %cst_105 = arith.constant dense<0.000000e+00> : vector<16x32xf32>
    %239 = tpu.matmul %237, %238, %cst_105 {dimension_numbers = #tpu.dot_dimension_numbers<[1], [0], [0], [1], [0, 0, 1, 1], [], []>} : vector<16x8xf32>, vector<8x32xf32>, vector<16x32xf32> -> vector<16x32xf32>
    %240 = vector.broadcast %219 : vector<1x32xf32> to vector<16x32xf32>
    %241 = arith.addf %240, %239 : vector<16x32xf32>
    %242 = vector.extract_strided_slice %213 {offsets = [0, 8], sizes = [16, 8], strides = [1, 1]} : vector<16x32xf32> to vector<16x8xf32>
    %243 = vector.extract_strided_slice %214 {offsets = [0, 8], sizes = [16, 8], strides = [1, 1]} : vector<16x32xf32> to vector<16x8xf32>
    %244 = vector.extract_strided_slice %215 {offsets = [0, 8], sizes = [16, 8], strides = [1, 1]} : vector<16x32xf32> to vector<16x8xf32>
    %cst_106 = arith.constant dense<0.000000e+00> : vector<16x16xf32>
    %245 = tpu.matmul %242, %243, %cst_106 {dimension_numbers = #tpu.dot_dimension_numbers<[1], [1], [0], [0], [0, 0, 1, 0], [], []>} : vector<16x8xf32>, vector<16x8xf32>, vector<16x16xf32> -> vector<16x16xf32>
    %cst_107 = arith.constant 0.353553385 : f32
    %246 = vector.broadcast %cst_107 : f32 to vector<16x16xf32>
    %247 = arith.mulf %245, %246 : vector<16x16xf32>
    %248 = arith.addf %247, %25 : vector<16x16xf32>
    %cst_108 = arith.constant dense<0xFF800000> : vector<16xf32>
    %249 = vector.multi_reduction <maximumf>, %248, %cst_108 [1] : vector<16x16xf32> to vector<16xf32>
    %250 = vector.shape_cast %249 : vector<16xf32> to vector<16x1xf32>
    %251 = vector.broadcast %250 : vector<16x1xf32> to vector<16x16xf32>
    %252 = arith.subf %248, %251 : vector<16x16xf32>
    %253 = math.exp %252 : vector<16x16xf32>
    %cst_109 = arith.constant dense<0.000000e+00> : vector<16xf32>
    %254 = vector.multi_reduction <add>, %253, %cst_109 [1] : vector<16x16xf32> to vector<16xf32>
    %255 = vector.shape_cast %254 : vector<16xf32> to vector<16x1xf32>
    %256 = tpu.reciprocal %255 {approx = true} : vector<16x1xf32> -> vector<16x1xf32>
    %257 = vector.broadcast %256 : vector<16x1xf32> to vector<16x16xf32>
    %258 = arith.mulf %253, %257 : vector<16x16xf32>
    %cst_110 = arith.constant dense<0.000000e+00> : vector<16x8xf32>
    %259 = tpu.matmul %258, %244, %cst_110 {dimension_numbers = #tpu.dot_dimension_numbers<[1], [0], [0], [1], [0, 0, 1, 1], [], []>} : vector<16x16xf32>, vector<16x8xf32>, vector<16x8xf32> -> vector<16x8xf32>
    %260 = vector.extract_strided_slice %217 {offsets = [8, 0], sizes = [8, 32], strides = [1, 1]} : vector<32x32xf32> to vector<8x32xf32>
    %cst_111 = arith.constant dense<0.000000e+00> : vector<16x32xf32>
    %261 = tpu.matmul %259, %260, %cst_111 {dimension_numbers = #tpu.dot_dimension_numbers<[1], [0], [0], [1], [0, 0, 1, 1], [], []>} : vector<16x8xf32>, vector<8x32xf32>, vector<16x32xf32> -> vector<16x32xf32>
    %262 = arith.addf %241, %261 : vector<16x32xf32>
    %263 = vector.extract_strided_slice %213 {offsets = [0, 16], sizes = [16, 8], strides = [1, 1]} : vector<16x32xf32> to vector<16x8xf32>
    %264 = vector.extract_strided_slice %214 {offsets = [0, 16], sizes = [16, 8], strides = [1, 1]} : vector<16x32xf32> to vector<16x8xf32>
    %265 = vector.extract_strided_slice %215 {offsets = [0, 16], sizes = [16, 8], strides = [1, 1]} : vector<16x32xf32> to vector<16x8xf32>
    %cst_112 = arith.constant dense<0.000000e+00> : vector<16x16xf32>
    %266 = tpu.matmul %263, %264, %cst_112 {dimension_numbers = #tpu.dot_dimension_numbers<[1], [1], [0], [0], [0, 0, 1, 0], [], []>} : vector<16x8xf32>, vector<16x8xf32>, vector<16x16xf32> -> vector<16x16xf32>
    %cst_113 = arith.constant 0.353553385 : f32
    %267 = vector.broadcast %cst_113 : f32 to vector<16x16xf32>
    %268 = arith.mulf %266, %267 : vector<16x16xf32>
    %269 = arith.addf %268, %25 : vector<16x16xf32>
    %cst_114 = arith.constant dense<0xFF800000> : vector<16xf32>
    %270 = vector.multi_reduction <maximumf>, %269, %cst_114 [1] : vector<16x16xf32> to vector<16xf32>
    %271 = vector.shape_cast %270 : vector<16xf32> to vector<16x1xf32>
    %272 = vector.broadcast %271 : vector<16x1xf32> to vector<16x16xf32>
    %273 = arith.subf %269, %272 : vector<16x16xf32>
    %274 = math.exp %273 : vector<16x16xf32>
    %cst_115 = arith.constant dense<0.000000e+00> : vector<16xf32>
    %275 = vector.multi_reduction <add>, %274, %cst_115 [1] : vector<16x16xf32> to vector<16xf32>
    %276 = vector.shape_cast %275 : vector<16xf32> to vector<16x1xf32>
    %277 = tpu.reciprocal %276 {approx = true} : vector<16x1xf32> -> vector<16x1xf32>
    %278 = vector.broadcast %277 : vector<16x1xf32> to vector<16x16xf32>
    %279 = arith.mulf %274, %278 : vector<16x16xf32>
    %cst_116 = arith.constant dense<0.000000e+00> : vector<16x8xf32>
    %280 = tpu.matmul %279, %265, %cst_116 {dimension_numbers = #tpu.dot_dimension_numbers<[1], [0], [0], [1], [0, 0, 1, 1], [], []>} : vector<16x16xf32>, vector<16x8xf32>, vector<16x8xf32> -> vector<16x8xf32>
    %281 = vector.extract_strided_slice %217 {offsets = [16, 0], sizes = [8, 32], strides = [1, 1]} : vector<32x32xf32> to vector<8x32xf32>
    %cst_117 = arith.constant dense<0.000000e+00> : vector<16x32xf32>
    %282 = tpu.matmul %280, %281, %cst_117 {dimension_numbers = #tpu.dot_dimension_numbers<[1], [0], [0], [1], [0, 0, 1, 1], [], []>} : vector<16x8xf32>, vector<8x32xf32>, vector<16x32xf32> -> vector<16x32xf32>
    %283 = arith.addf %262, %282 : vector<16x32xf32>
    %284 = vector.extract_strided_slice %213 {offsets = [0, 24], sizes = [16, 8], strides = [1, 1]} : vector<16x32xf32> to vector<16x8xf32>
    %285 = vector.extract_strided_slice %214 {offsets = [0, 24], sizes = [16, 8], strides = [1, 1]} : vector<16x32xf32> to vector<16x8xf32>
    %286 = vector.extract_strided_slice %215 {offsets = [0, 24], sizes = [16, 8], strides = [1, 1]} : vector<16x32xf32> to vector<16x8xf32>
    %cst_118 = arith.constant dense<0.000000e+00> : vector<16x16xf32>
    %287 = tpu.matmul %284, %285, %cst_118 {dimension_numbers = #tpu.dot_dimension_numbers<[1], [1], [0], [0], [0, 0, 1, 0], [], []>} : vector<16x8xf32>, vector<16x8xf32>, vector<16x16xf32> -> vector<16x16xf32>
    %cst_119 = arith.constant 0.353553385 : f32
    %288 = vector.broadcast %cst_119 : f32 to vector<16x16xf32>
    %289 = arith.mulf %287, %288 : vector<16x16xf32>
    %290 = arith.addf %289, %25 : vector<16x16xf32>
    %cst_120 = arith.constant dense<0xFF800000> : vector<16xf32>
    %291 = vector.multi_reduction <maximumf>, %290, %cst_120 [1] : vector<16x16xf32> to vector<16xf32>
    %292 = vector.shape_cast %291 : vector<16xf32> to vector<16x1xf32>
    %293 = vector.broadcast %292 : vector<16x1xf32> to vector<16x16xf32>
    %294 = arith.subf %290, %293 : vector<16x16xf32>
    %295 = math.exp %294 : vector<16x16xf32>
    %cst_121 = arith.constant dense<0.000000e+00> : vector<16xf32>
    %296 = vector.multi_reduction <add>, %295, %cst_121 [1] : vector<16x16xf32> to vector<16xf32>
    %297 = vector.shape_cast %296 : vector<16xf32> to vector<16x1xf32>
    %298 = tpu.reciprocal %297 {approx = true} : vector<16x1xf32> -> vector<16x1xf32>
    %299 = vector.broadcast %298 : vector<16x1xf32> to vector<16x16xf32>
    %300 = arith.mulf %295, %299 : vector<16x16xf32>
    %cst_122 = arith.constant dense<0.000000e+00> : vector<16x8xf32>
    %301 = tpu.matmul %300, %286, %cst_122 {dimension_numbers = #tpu.dot_dimension_numbers<[1], [0], [0], [1], [0, 0, 1, 1], [], []>} : vector<16x16xf32>, vector<16x8xf32>, vector<16x8xf32> -> vector<16x8xf32>
    %302 = vector.extract_strided_slice %217 {offsets = [24, 0], sizes = [8, 32], strides = [1, 1]} : vector<32x32xf32> to vector<8x32xf32>
    %cst_123 = arith.constant dense<0.000000e+00> : vector<16x32xf32>
    %303 = tpu.matmul %301, %302, %cst_123 {dimension_numbers = #tpu.dot_dimension_numbers<[1], [0], [0], [1], [0, 0, 1, 1], [], []>} : vector<16x8xf32>, vector<8x32xf32>, vector<16x32xf32> -> vector<16x32xf32>
    %304 = arith.addf %283, %303 : vector<16x32xf32>
    %305 = arith.addf %304, %205 : vector<16x32xf32>
    %c1_124 = arith.constant 1 : index
    %c0_125 = arith.constant 0 : index
    %c0_126 = arith.constant 0 : index
    %306 = vector.load %arg9[%c1_124, %c0_125, %c0_126] : memref<2x1x32xf32, #tpu.memory_space<vmem>>, vector<1x1x32xf32>
    %307 = vector.shape_cast %306 : vector<1x1x32xf32> to vector<1x32xf32>
    %c1_127 = arith.constant 1 : index
    %c0_128 = arith.constant 0 : index
    %c0_129 = arith.constant 0 : index
    %308 = vector.load %arg10[%c1_127, %c0_128, %c0_129] : memref<2x1x32xf32, #tpu.memory_space<vmem>>, vector<1x1x32xf32>
    %309 = vector.shape_cast %308 : vector<1x1x32xf32> to vector<1x32xf32>
    %cst_130 = arith.constant dense<0.000000e+00> : vector<16xf32>
    %310 = vector.multi_reduction <add>, %305, %cst_130 [1] : vector<16x32xf32> to vector<16xf32>
    %311 = vector.shape_cast %310 : vector<16xf32> to vector<16x1xf32>
    %cst_131 = arith.constant 3.200000e+01 : f32
    %312 = vector.broadcast %cst_131 : f32 to vector<16x1xf32>
    %313 = arith.divf %311, %312 : vector<16x1xf32>
    %314 = vector.broadcast %313 : vector<16x1xf32> to vector<16x32xf32>
    %315 = arith.subf %305, %314 : vector<16x32xf32>
    %316 = arith.mulf %315, %315 : vector<16x32xf32>
    %cst_132 = arith.constant dense<0.000000e+00> : vector<16xf32>
    %317 = vector.multi_reduction <add>, %316, %cst_132 [1] : vector<16x32xf32> to vector<16xf32>
    %318 = vector.shape_cast %317 : vector<16xf32> to vector<16x1xf32>
    %cst_133 = arith.constant 3.200000e+01 : f32
    %319 = vector.broadcast %cst_133 : f32 to vector<16x1xf32>
    %320 = arith.divf %318, %319 : vector<16x1xf32>
    %321 = vector.broadcast %313 : vector<16x1xf32> to vector<16x32xf32>
    %322 = arith.subf %305, %321 : vector<16x32xf32>
    %cst_134 = arith.constant 9.99999996E-13 : f32
    %323 = vector.broadcast %cst_134 : f32 to vector<16x1xf32>
    %324 = arith.addf %320, %323 : vector<16x1xf32>
    %325 = math.rsqrt %324 : vector<16x1xf32>
    %326 = vector.broadcast %325 : vector<16x1xf32> to vector<16x32xf32>
    %327 = arith.mulf %322, %326 : vector<16x32xf32>
    %328 = vector.broadcast %307 : vector<1x32xf32> to vector<16x32xf32>
    %329 = arith.mulf %327, %328 : vector<16x32xf32>
    %330 = vector.broadcast %309 : vector<1x32xf32> to vector<16x32xf32>
    %331 = arith.addf %329, %330 : vector<16x32xf32>
    %c1_135 = arith.constant 1 : index
    %c0_136 = arith.constant 0 : index
    %c0_137 = arith.constant 0 : index
    %332 = vector.load %arg11[%c1_135, %c0_136, %c0_137] : memref<2x32x64xf32, #tpu.memory_space<vmem>>, vector<1x32x64xf32>
    %333 = vector.shape_cast %332 : vector<1x32x64xf32> to vector<32x64xf32>
    %cst_138 = arith.constant dense<0.000000e+00> : vector<16x64xf32>
    %334 = tpu.matmul %331, %333, %cst_138 {dimension_numbers = #tpu.dot_dimension_numbers<[1], [0], [0], [1], [0, 0, 1, 1], [], []>} : vector<16x32xf32>, vector<32x64xf32>, vector<16x64xf32> -> vector<16x64xf32>
    %c1_139 = arith.constant 1 : index
    %c0_140 = arith.constant 0 : index
    %c0_141 = arith.constant 0 : index
    %335 = vector.load %arg12[%c1_139, %c0_140, %c0_141] : memref<2x1x64xf32, #tpu.memory_space<vmem>>, vector<1x1x64xf32>
    %336 = vector.shape_cast %335 : vector<1x1x64xf32> to vector<1x64xf32>
    %337 = vector.broadcast %336 : vector<1x64xf32> to vector<16x64xf32>
    %338 = arith.addf %334, %337 : vector<16x64xf32>
    %339 = arith.mulf %338, %338 : vector<16x64xf32>
    %340 = arith.mulf %338, %339 : vector<16x64xf32>
    %cst_142 = arith.constant 4.471500e-02 : f32
    %341 = vector.broadcast %cst_142 : f32 to vector<16x64xf32>
    %342 = arith.mulf %341, %340 : vector<16x64xf32>
    %343 = arith.addf %338, %342 : vector<16x64xf32>
    %cst_143 = arith.constant 0.797884583 : f32
    %344 = vector.broadcast %cst_143 : f32 to vector<16x64xf32>
    %345 = arith.mulf %344, %343 : vector<16x64xf32>
    %346 = math.tanh %345 : vector<16x64xf32>
    %cst_144 = arith.constant 1.000000e+00 : f32
    %347 = vector.broadcast %cst_144 : f32 to vector<16x64xf32>
    %348 = arith.addf %347, %346 : vector<16x64xf32>
    %cst_145 = arith.constant 5.000000e-01 : f32
    %349 = vector.broadcast %cst_145 : f32 to vector<16x64xf32>
    %350 = arith.mulf %349, %348 : vector<16x64xf32>
    %351 = arith.mulf %338, %350 : vector<16x64xf32>
    %c1_146 = arith.constant 1 : index
    %c0_147 = arith.constant 0 : index
    %c0_148 = arith.constant 0 : index
    %352 = vector.load %arg13[%c1_146, %c0_147, %c0_148] : memref<2x64x32xf32, #tpu.memory_space<vmem>>, vector<1x64x32xf32>
    %353 = vector.shape_cast %352 : vector<1x64x32xf32> to vector<64x32xf32>
    %cst_149 = arith.constant dense<0.000000e+00> : vector<16x32xf32>
    %354 = tpu.matmul %351, %353, %cst_149 {dimension_numbers = #tpu.dot_dimension_numbers<[1], [0], [0], [1], [0, 0, 1, 1], [], []>} : vector<16x64xf32>, vector<64x32xf32>, vector<16x32xf32> -> vector<16x32xf32>
    %c1_150 = arith.constant 1 : index
    %c0_151 = arith.constant 0 : index
    %c0_152 = arith.constant 0 : index
    %355 = vector.load %arg14[%c1_150, %c0_151, %c0_152] : memref<2x1x32xf32, #tpu.memory_space<vmem>>, vector<1x1x32xf32>
    %356 = vector.shape_cast %355 : vector<1x1x32xf32> to vector<1x32xf32>
    %357 = vector.broadcast %356 : vector<1x32xf32> to vector<16x32xf32>
    %358 = arith.addf %354, %357 : vector<16x32xf32>
    %359 = arith.addf %358, %331 : vector<16x32xf32>
    %c1_153 = arith.constant 1 : index
    %c0_154 = arith.constant 0 : index
    %c0_155 = arith.constant 0 : index
    %360 = vector.load %arg15[%c1_153, %c0_154, %c0_155] : memref<2x1x32xf32, #tpu.memory_space<vmem>>, vector<1x1x32xf32>
    %361 = vector.shape_cast %360 : vector<1x1x32xf32> to vector<1x32xf32>
    %c1_156 = arith.constant 1 : index
    %c0_157 = arith.constant 0 : index
    %c0_158 = arith.constant 0 : index
    %362 = vector.load %arg16[%c1_156, %c0_157, %c0_158] : memref<2x1x32xf32, #tpu.memory_space<vmem>>, vector<1x1x32xf32>
    %363 = vector.shape_cast %362 : vector<1x1x32xf32> to vector<1x32xf32>
    %cst_159 = arith.constant dense<0.000000e+00> : vector<16xf32>
    %364 = vector.multi_reduction <add>, %359, %cst_159 [1] : vector<16x32xf32> to vector<16xf32>
    %365 = vector.shape_cast %364 : vector<16xf32> to vector<16x1xf32>
    %cst_160 = arith.constant 3.200000e+01 : f32
    %366 = vector.broadcast %cst_160 : f32 to vector<16x1xf32>
    %367 = arith.divf %365, %366 : vector<16x1xf32>
    %368 = vector.broadcast %367 : vector<16x1xf32> to vector<16x32xf32>
    %369 = arith.subf %359, %368 : vector<16x32xf32>
    %370 = arith.mulf %369, %369 : vector<16x32xf32>
    %cst_161 = arith.constant dense<0.000000e+00> : vector<16xf32>
    %371 = vector.multi_reduction <add>, %370, %cst_161 [1] : vector<16x32xf32> to vector<16xf32>
    %372 = vector.shape_cast %371 : vector<16xf32> to vector<16x1xf32>
    %cst_162 = arith.constant 3.200000e+01 : f32
    %373 = vector.broadcast %cst_162 : f32 to vector<16x1xf32>
    %374 = arith.divf %372, %373 : vector<16x1xf32>
    %375 = vector.broadcast %367 : vector<16x1xf32> to vector<16x32xf32>
    %376 = arith.subf %359, %375 : vector<16x32xf32>
    %cst_163 = arith.constant 9.99999996E-13 : f32
    %377 = vector.broadcast %cst_163 : f32 to vector<16x1xf32>
    %378 = arith.addf %374, %377 : vector<16x1xf32>
    %379 = math.rsqrt %378 : vector<16x1xf32>
    %380 = vector.broadcast %379 : vector<16x1xf32> to vector<16x32xf32>
    %381 = arith.mulf %376, %380 : vector<16x32xf32>
    %382 = vector.broadcast %361 : vector<1x32xf32> to vector<16x32xf32>
    %383 = arith.mulf %381, %382 : vector<16x32xf32>
    %384 = vector.broadcast %363 : vector<1x32xf32> to vector<16x32xf32>
    %385 = arith.addf %383, %384 : vector<16x32xf32>
    %c0_164 = arith.constant 0 : index
    %c0_165 = arith.constant 0 : index
    %386 = vector.load %arg2[%c0_164, %c0_165] : memref<2x16xf32, #tpu.memory_space<vmem>>, vector<2x16xf32>
    %cst_166 = arith.constant dense<0.000000e+00> : vector<2x32xf32>
    %387 = tpu.matmul %386, %385, %cst_166 {dimension_numbers = #tpu.dot_dimension_numbers<[1], [0], [0], [1], [0, 0, 1, 1], [], []>} : vector<2x16xf32>, vector<16x32xf32>, vector<2x32xf32> -> vector<2x32xf32>
    %c0_167 = arith.constant 0 : index
    %c0_168 = arith.constant 0 : index
    %388 = vector.load %arg17[%c0_167, %c0_168] : memref<32x32xf32, #tpu.memory_space<vmem>>, vector<32x32xf32>
    %cst_169 = arith.constant dense<0.000000e+00> : vector<2x32xf32>
    %389 = tpu.matmul %387, %388, %cst_169 {dimension_numbers = #tpu.dot_dimension_numbers<[1], [0], [0], [1], [0, 0, 1, 1], [], []>} : vector<2x32xf32>, vector<32x32xf32>, vector<2x32xf32> -> vector<2x32xf32>
    %c0_170 = arith.constant 0 : index
    %c0_171 = arith.constant 0 : index
    %390 = vector.load %arg18[%c0_170, %c0_171] : memref<1x32xf32, #tpu.memory_space<vmem>>, vector<1x32xf32>
    %391 = vector.broadcast %390 : vector<1x32xf32> to vector<2x32xf32>
    %392 = arith.addf %389, %391 : vector<2x32xf32>
    %393 = math.tanh %392 : vector<2x32xf32>
    %c0_172 = arith.constant 0 : index
    %c0_173 = arith.constant 0 : index
    %394 = vector.load %arg19[%c0_172, %c0_173] : memref<32x4xf32, #tpu.memory_space<vmem>>, vector<32x4xf32>
    %cst_174 = arith.constant dense<0.000000e+00> : vector<2x4xf32>
    %395 = tpu.matmul %393, %394, %cst_174 {dimension_numbers = #tpu.dot_dimension_numbers<[1], [0], [0], [1], [0, 0, 1, 1], [], []>} : vector<2x32xf32>, vector<32x4xf32>, vector<2x4xf32> -> vector<2x4xf32>
    %c0_175 = arith.constant 0 : index
    %c0_176 = arith.constant 0 : index
    %396 = vector.load %arg20[%c0_175, %c0_176] : memref<1x4xf32, #tpu.memory_space<vmem>>, vector<1x4xf32>
    %397 = vector.broadcast %396 : vector<1x4xf32> to vector<2x4xf32>
    %398 = arith.addf %395, %397 : vector<2x4xf32>
    %c0_177 = arith.constant 0 : index
    %c0_178 = arith.constant 0 : index
    %399 = vector.load %arg21[%c0_177, %c0_178] : memref<2x32xf32, #tpu.memory_space<vmem>>, vector<2x32xf32>
    tpu.vector_store %arg21[%c0_177, %c0_178], %393 {strides = array<i32>} : memref<2x32xf32, #tpu.memory_space<vmem>>, vector<2x32xf32>,
    %c0_179 = arith.constant 0 : index
    %c0_180 = arith.constant 0 : index
    %400 = vector.load %arg22[%c0_179, %c0_180] : memref<2x4xf32, #tpu.memory_space<vmem>>, vector<2x4xf32>
    tpu.vector_store %arg22[%c0_179, %c0_180], %398 {strides = array<i32>} : memref<2x4xf32, #tpu.memory_space<vmem>>, vector<2x4xf32>,
    return
  }
}

</mosaic_0001>

<bundles_post_ra>
// kernel: model_forward.1
= control target key start
LH: loop header
LB: loop body
LE: loop exit
PB: predicated region body
PF: predicated region fallthrough
CT: control target
= control target key end

     0   :  { %s5094_s0 = inlined_call_operand.vmem [shape: f32[16,32], index: 0, kind: input, shape index: {}]   ;;  %s5095_s1 = inlined_call_operand.vmem [shape: f32[16,16], index: 1, kind: input, shape index: {}]   ;;  %s5096_s2 = inlined_call_operand.vmem [shape: f32[2,16], index: 2, kind: input, shape index: {}]   ;;  %s5097_s3 = inlined_call_operand.vmem [shape: f32[1,32], index: 3, kind: input, shape index: {}]   ;;  %s5098_s4 = inlined_call_operand.vmem [shape: f32[1,32], index: 4, kind: input, shape index: {}]   ;;  %s5099_s5 = inlined_call_operand.vmem [shape: f32[2,32,96], index: 5, kind: input, shape index: {}]   ;;  %s5100_s6 = inlined_call_operand.vmem [shape: f32[2,1,96], index: 6, kind: input, shape index: {}]   ;;  %s5101_s7 = inlined_call_operand.vmem [shape: f32[2,32,32], index: 7, kind: input, shape index: {}]   ;;  %s5102_s8 = inlined_call_operand.vmem [shape: f32[2,1,32], index: 8, kind: input, shape index: {}]   ;;  %s5103_s9 = inlined_call_operand.vmem [shape: f32[2,1,32], index: 9, kind: input, shape index: {}]   ;;  %s5104_s10 = inlined_call_operand.vmem [shape: f32[2,1,32], index: 10, kind: input, shape index: {}]   ;;  %s5105_s11 = inlined_call_operand.vmem [shape: f32[2,32,64], index: 11, kind: input, shape index: {}]   ;;  %s5106_s12 = inlined_call_operand.vmem [shape: f32[2,1,64], index: 12, kind: input, shape index: {}]   ;;  %s5107_s13 = inlined_call_operand.vmem [shape: f32[2,64,32], index: 13, kind: input, shape index: {}]   ;;  %s5108_s14 = inlined_call_operand.vmem [shape: f32[2,1,32], index: 14, kind: input, shape index: {}]   ;;  %s5109_s15 = inlined_call_operand.vmem [shape: f32[2,1,32], index: 15, kind: input, shape index: {}]   ;;  %s5110_s16 = inlined_call_operand.vmem [shape: f32[2,1,32], index: 16, kind: input, shape index: {}]   ;;  %s5111_s17 = inlined_call_operand.vmem [shape: f32[32,32], index: 17, kind: input, shape index: {}]   ;;  %s5112_s18 = inlined_call_operand.vmem [shape: f32[1,32], index: 18, kind: input, shape index: {}]   ;;  %s5113_s19 = inlined_call_operand.vmem [shape: f32[32,4], index: 19, kind: input, shape index: {}]   ;;  %s5114_s20 = inlined_call_operand.vmem [shape: f32[1,4], index: 20, kind: input, shape index: {}]   ;;  %s5115_s21 = inlined_call_operand.hbm [shape: f32[2,32], index: 21, kind: output, shape index: {0}]   ;;  %s5116_s22 = inlined_call_operand.hbm [shape: f32[2,4], index: 22, kind: output, shape index: {1}]  }
   0x1   :  { %5130 = sst [smem:[#allocation8_spill]] %s5094_s0 }
   0x2   :  { %5131 = sst [smem:[#allocation9_spill]] %s5095_s1 }
   0x3   :  { %5132 = sst [smem:[#allocation10_spill]] %s5096_s2 }
   0x4   :  { %5133 = sst [smem:[#allocation11_spill]] %s5097_s3 }
   0x5   :  { %5134 = sst [smem:[#allocation12_spill]] %s5098_s4 }
   0x6   :  { %5135 = sst [smem:[#allocation13_spill]] %s5099_s5 }
   0x7   :  { %5136 = sst [smem:[#allocation14_spill]] %s5100_s6 }
   0x8   :  { %28 = vsyncpa [#allocation3], 0  ;;  %s5137_s29 = sld [smem:[#allocation8_spill]]  ;;  %vm76_vm0 = vcmask 261120  }
   0xe   :  { %v72_v0 = vld [vmem:[%s5137_s29] sm:$0xff]  ;;  %v73_v1 = vld [vmem:[%s5137_s29 + $0x8] sm:$0xff] }
   0xf   :  { %29 = vsyncpa [#allocation5], 0  ;;  %v77_v2 = vsel %vm76_vm0, %v72_v0, 0.0  ;;  %v80_v3 = vsel %vm76_vm0, %v73_v1, 0.0  ;;  %s5138_s1 = sld [smem:[#allocation13_spill]]  ;;  %s5139_s28 = sld [smem:[#allocation11_spill]] }
  0x10   :  { %78 = vadd.xlane.f32.xlu0 %v77_v2  ;;  %s5140_s4 = sld [smem:[#allocation12_spill]]  ;;  %s5141_s5 = sld [smem:[#allocation14_spill]]  ;;  %vm225_vm1 = vcmask 64512   ;;  %vm313_vm3 = vcmask 130048   ;;  %vm1544_vm4 = vcmask 523264   ;;  %vm4468_vm5 = vmmov 0  }
  0x11   :  { %s4456_s24 = smov 96   ;;  %s4457_s6 = smov 88   ;;  %vm4648_vm2 = vmpackc.low %vm225_vm1, %vm225_vm1  ;;  %vm3474_vm6 = vcmask 254976  }
  0x12   :  { %s4458_s25 = smov 120   ;;  %s5128_s26 = smov 112  }
  0x13   :  { %s5144_s3 = sld [smem:[#allocation9_spill]]  ;;  %s5124_s30 = smov 64  }
  0x14   :  { %81 = vadd.xlane.f32.xlu0 %v80_v3  ;;  %s5127_s2 = smov 72   ;;  %s5125_s27 = smov 104  }
  0x15   :  { %v122_v14 = vld [vmem:[%s5138_s1] sm:$0xff]  ;;  %v123_v15 = vld [vmem:[%s5138_s1 + $0x8] sm:$0xff]  ;;  %v124_v16 = vld [vmem:[%s5138_s1 + $0x10] sm:$0xff]  ;;  %s5121_s23 = smov 48   ;;  %s5122_s29 = smov 40  }
  0x16   :  { %v4041_v17 = vpack.c.bf16 %v123_v15, %v122_v14  ;;  %v125_v18 = vld [vmem:[%s5138_s1 + $0x18] sm:$0xff]  ;;  %v3506_v27 = vld [vmem:[%s5139_s28] ss:$0 sm:$0xff]  ;;  %s5123_s28 = smov 56  }
  0x17   :  { %v4045_v19 = vpack.c.bf16 %v125_v18, %v124_v16  ;;  %v3507_v29 = vld [vmem:[%s5140_s4] ss:$0 sm:$0xff]  ;;  %s4461_s4 = smov 80  }
  0x18   :  { %4042 = vmatprep.subr.bf16.mxu0 %v4041_v17  ;;  %v3508_v36 = vld [vmem:[%s5141_s5] ss:$0 sm:$0xff] }
  0x19   :  { %4044 = vmatpush3.bf16.msra.mxu0 %v4041_v17  ;;  %v4661_v49 = vld [vmem:[%s5144_s3] sm:$0xff]  ;;  %v4666_v52 = vld [vmem:[%s5144_s3 + $0x8] sm:$0xff] }
  0x1a   :  { %4046 = vmatprep.subr.bf16.mxu0 %v4045_v19 }
  0x1d   :  { %4048 = vmatpush3.bf16.msra.mxu0 %v4045_v19 }
  0x9d   :  { %v79_v4 = vpop.xlane.xlu0 %78 }
  0x9e   :  { %v84_v5 = vmul.f32 0.03125, %v79_v4 }
  0xa0   :  { %v86_v6 = vsub.f32 %v72_v0, %v84_v5 }
  0xa1   :  { %v82_v7 = vpop.xlane.xlu0 %81 }
  0xa2   :  { %v85_v8 = vmul.f32 0.03125, %v82_v7  ;;  %v88_v9 = vmul.f32 %v86_v6, %v86_v6 }
  0xa4   :  { %v87_v10 = vsub.f32 %v73_v1, %v85_v8  ;;  %v90_v11 = vsel %vm76_vm0, %v88_v9, 0.0 }
  0xa5   :  { %91 = vadd.xlane.f32.xlu1 %v90_v11 }
  0xa6   :  { %v89_v12 = vmul.f32 %v87_v10, %v87_v10 }
  0xa8   :  { %v93_v13 = vsel %vm76_vm0, %v89_v12, 0.0 }
  0xa9   :  { %94 = vadd.xlane.f32.xlu1 %v93_v13 }
 0x132   :  { %v92_v20 = vpop.xlane.xlu1 %91 }
 0x133   :  { %v96_v21 = vmul.f32 0.03125, %v92_v20 }
 0x135   :  { %v98_v22 = vadd.f32 1e-12, %v96_v21 }
 0x136   :  { %v95_v23 = vpop.xlane.xlu1 %94 }
 0x137   :  { %4312 = vrsqrt.f32 %v98_v22  ;;  %v97_v24 = vmul.f32 0.03125, %v95_v23 }
 0x139   :  { %v99_v25 = vadd.f32 1e-12, %v97_v24 }
 0x13b   :  { %4314 = vrsqrt.f32 %v99_v25  ;;  %v214_v25 = vld [vmem:[%s5101_s7] sm:$0xff] }
 0x141   :  { %v4313_v26 = vpop.eup %4312 }
 0x142   :  { %v102_v28 = vmul.f32 %v4313_v26, %v86_v6 }
 0x144   :  { %v110_v30 = vmul.f32 %v3506_v27, %v102_v28 }
 0x145   :  { %v4315_v31 = vpop.eup %4314 }
 0x146   :  { %v103_v32 = vmul.f32 %v4315_v31, %v87_v10  ;;  %v4615_v33 = vadd.f32 %v3507_v29, %v110_v30 }
 0x148   :  { %v111_v34 = vmul.f32 %v3506_v27, %v103_v32  ;;  %3786 = vmatprep.mubr.msk.f32.mxu0 %vm76_vm0, %v4615_v33 }
 0x14a   :  { %v4619_v35 = vadd.f32 %v3507_v29, %v111_v34 }
 0x14c   :  { %3787 = vmatmul.mubr.msk.f32.vlgmr.msra.gmra.mrb[0].mxu0 %vm76_vm0, %v4619_v35 }
 0x21f   :  { %v3788_v37 = vpop.f32.mrb[0].mxu0 }
 0x220   :  { %v4626_v38 = vadd.f32 %v3788_v37, %v3508_v36  ;;  %v205_v39 = vpop.f32.mrb[1].mxu0 }
 0x221   :  { %v4628_v40 = vadd.f32 %v3508_v36, %v205_v39 }
 0x223   :  { %3793 = vmatprep.mubr.msk.f32.mxu1 %vm225_vm1, %v4628_v40  ;;  %v4634_v41 = vpack.i.bf16 %v4626_v38, %v4628_v40 }
 0x225   :  { %4233 = vrot.lane.b32.xlu0 %v4634_v41, %s4456_s24 }
 0x229   :  { %4243 = vrot.lane.b32.xlu0 %v4634_v41, %s4457_s6 }
 0x22d   :  { %512 = vrot.lane.b32.xlu0 %v4628_v40, %s4458_s25 }
 0x231   :  { %514 = vrot.lane.b32.xlu0 %v4626_v38, %s4458_s25 }
 0x235   :  { %799 = vrot.lane.b32.xlu0 %v4628_v40, %s5128_s26 }
 0x297   :  { %v4234_v42 = vpop.permute.xlu0 %4233 }
 0x298   :  { %v4236_v43 = vunpack.i.h.bf16 %v4234_v42  ;;  %v4235_v44 = vunpack.i.l.bf16 %v4234_v42 }
 0x29a   :  { %v4049_v46 = vpack.c.bf16 %v4236_v43, %v4235_v44 }
 0x29b   :  { %v4244_v5 = vpop.permute.xlu0 %4243 }
 0x29c   :  { %4051 = vmatprep.subr.msk.bf16.mxu1 %vm4648_vm2, %v4049_v46  ;;  %v4246_v7 = vunpack.i.h.bf16 %v4244_v5  ;;  %v4245_v8 = vunpack.i.l.bf16 %v4244_v5 }
 0x29d   :  { %4054 = vmatpush3.bf16.xpose.msk.msra.mxu1 %vm4648_vm2, %v4049_v46 }
 0x29e   :  { %v4059_v12 = vpack.c.bf16 %v4246_v7, %v4245_v8  ;;  %3803 = vmatprep.subr.mxu1 %v214_v25 }
 0x29f   :  { %v513_v18 = vpop.permute.xlu0 %512 }
 0x2a3   :  { %v515_v22 = vpop.permute.xlu0 %514 }
 0x2a4   :  { %3794 = vmatmul.mubr.msk.f32.vlgmr.msra.gmra.mrb[0].mxu1 %vm225_vm1, %v4626_v38 }
 0x2a5   :  { %3804 = vmatpush3.msra.mxu1 %v214_v25 }
 0x2a7   :  { %v800_v23 = vpop.permute.xlu0 %799 }
 0x377   :  { %v3795_v47 = vpop.f32.mrb[0].mxu1 }
 0x378   :  { %v300_v48 = vpop.f32.mrb[1].mxu1  ;;  %v310_v50 = vmul.f32 0.35355338, %v3795_v47 }
 0x379   :  { %v309_v51 = vmul.f32 0.35355338, %v300_v48 }
 0x37a   :  { %v312_v55 = vadd.f32 %v310_v50, %v4666_v52 }
 0x37b   :  { %v311_v53 = vadd.f32 %v309_v51, %v4661_v49 }
 0x37c   :  { %v317_v56 = vsel %vm313_vm3, %v312_v55, -inf }
 0x37d   :  { %v314_v54 = vsel %vm313_vm3, %v311_v53, -inf }
 0x37e   :  { %315 = vmax.xlane.f32.xlu1 %v314_v54 }
 0x382   :  { %318 = vmax.xlane.f32.xlu1 %v317_v56 }
 0x40b   :  { %v316_v57 = vpop.xlane.xlu1 %315 }
 0x40c   :  { %v320_v58 = vsub.f32 %v311_v53, %v316_v57 }
 0x40e   :  { %v322_v61 = vmul.f32 1.442695, %v320_v58 }
 0x40f   :  { %v319_v59 = vpop.xlane.xlu1 %318 }
 0x410   :  { %v321_v60 = vsub.f32 %v312_v55, %v319_v59 }
 0x412   :  { %v324_v62 = vmul.f32 1.442695, %v321_v60 }
 0x414   :  { %4316 = vpow2.f32 %v324_v62 }
 0x415   :  { %4318 = vpow2.f32 %v322_v61 }
 0x41e   :  { %v4317_v63 = vpop.eup %4316 }
 0x41f   :  { %v329_v0 = vsel %vm313_vm3, %v4317_v63, 0.0  ;;  %v4319_v1 = vpop.eup %4318 }
 0x420   :  { %330 = vadd.xlane.f32.xlu1 %v329_v0  ;;  %v326_v2 = vsel %vm313_vm3, %v4319_v1, 0.0 }
 0x424   :  { %327 = vadd.xlane.f32.xlu1 %v326_v2 }
 0x435   :  { %4238 = vrot.lane.b32.xlu1 %v4634_v41, %s5124_s30 }
 0x439   :  { %4248 = vrot.lane.b32.xlu1 %v4634_v41, %s4461_s4 }
 0x43d   :  { %801 = vrot.lane.b32.xlu1 %v4626_v38, %s5128_s26 }
 0x4ad   :  { %v331_v3 = vpop.xlane.xlu1 %330 }
 0x4ae   :  { %4320 = vrcp.f32 %v331_v3 }
 0x4b1   :  { %v328_v4 = vpop.xlane.xlu1 %327 }
 0x4b2   :  { %4322 = vrcp.f32 %v328_v4 }
 0x4b5   :  { %v4239_v6 = vpop.permute.xlu1 %4238 }
 0x4b6   :  { %v4241_v9 = vunpack.i.h.bf16 %v4239_v6  ;;  %v4240_v10 = vunpack.i.l.bf16 %v4239_v6 }
 0x4b8   :  { %v4055_v11 = vpack.c.bf16 %v4241_v9, %v4240_v10  ;;  %v4321_v13 = vpop.eup %4320 }
 0x4b9   :  { %v4249_v15 = vpop.permute.xlu1 %4248  ;;  %v335_v17 = vmul.f32 %v4321_v13, %v4317_v63 }
 0x4ba   :  { %4056 = vmatprep.subr.bf16.mxu0 %v4055_v11  ;;  %v4251_v19 = vunpack.i.h.bf16 %v4249_v15  ;;  %v4250_v20 = vunpack.i.l.bf16 %v4249_v15 }
 0x4bb   :  { %4058 = vmatpush3.bf16.msra.mxu0 %v4055_v11 }
 0x4bc   :  { %v4323_v14 = vpop.eup %4322  ;;  %4061 = vmatprep.subr.msk.bf16.mxu0 %vm4648_vm2, %v4059_v12  ;;  %v4069_v21 = vpack.c.bf16 %v4251_v19, %v4250_v20 }
 0x4bd   :  { %v334_v16 = vmul.f32 %v4323_v14, %v4319_v1  ;;  %v802_v24 = vpop.permute.xlu1 %801 }
 0x4bf   :  { %3800 = vmatprep.mubr.msk.f32.mxu0 %vm313_vm3, %v334_v16 }
 0x4c0   :  { %3801 = vmatmul.mubr.msk.f32.vlgmr.msra.gmra.mrb[2].mxu0 %vm313_vm3, %v335_v17 }
 0x4c1   :  { %3812 = vmatprep.mubr.msk.f32.mxu0 %vm225_vm1, %v513_v18 }
 0x4c4   :  { %4064 = vmatpush3.bf16.xpose.msk.msra.mxu0 %vm4648_vm2, %v4059_v12 }
 0x4c5   :  { %4071 = vmatprep.subr.msk.bf16.mxu0 %vm4648_vm2, %v4069_v21 }
 0x4cb   :  { %3813 = vmatmul.mubr.msk.f32.vlgmr.msra.gmra.mrb[4].mxu0 %vm225_vm1, %v515_v22 }
 0x4cc   :  { %4074 = vmatpush3.bf16.xpose.msk.msra.mxu0 %vm4648_vm2, %v4069_v21  ;;  %3831 = vmatprep.mubr.msk.f32.mxu0 %vm225_vm1, %v800_v23 }
 0x4d3   :  { %3832 = vmatmul.mubr.msk.f32.vlgmr.msra.gmra.mrb[6].mxu0 %vm225_vm1, %v802_v24 }
 0x593   :  { %v3802_v26 = vpop.f32.mrb[2].mxu0 }
 0x594   :  { %v414_v27 = vpop.f32.mrb[3].mxu0 }
 0x595   :  { %3805 = vmatprep.mubr.msk.f32.mxu1 %vm225_vm1, %v414_v27 }
 0x596   :  { %3806 = vmatmul.mubr.msk.f32.vlgmr.msra.gmra.mrb[2].mxu1 %vm225_vm1, %v3802_v26 }
 0x59e   :  { %v3814_v28 = vpop.f32.mrb[4].mxu0 }
 0x59f   :  { %v604_v29 = vmul.f32 0.35355338, %v3814_v28  ;;  %v594_v30 = vpop.f32.mrb[5].mxu0 }
 0x5a0   :  { %v603_v31 = vmul.f32 0.35355338, %v594_v30  ;;  %v215_v30 = vld [vmem:[%s5101_s7 + $0x8] sm:$0xff] }
 0x5a1   :  { %v606_v32 = vadd.f32 %v604_v29, %v4666_v52 }
 0x5a2   :  { %v605_v34 = vadd.f32 %v603_v31, %v4661_v49 }
 0x5a3   :  { %v610_v36 = vsel %vm313_vm3, %v606_v32, -inf }
 0x5a4   :  { %611 = vmax.xlane.f32.xlu1 %v610_v36  ;;  %v607_v37 = vsel %vm313_vm3, %v605_v34, -inf }
 0x5a5   :  { %608 = vmax.xlane.f32.xlu0 %v607_v37 }
 0x5a6   :  { %v3833_v39 = vpop.f32.mrb[6].mxu0 }
 0x5a7   :  { %v881_v42 = vpop.f32.mrb[7].mxu0  ;;  %v891_v43 = vmul.f32 0.35355338, %v3833_v39 }
 0x5a8   :  { %v890_v2 = vmul.f32 0.35355338, %v881_v42 }
 0x5a9   :  { %v893_v44 = vadd.f32 %v891_v43, %v4666_v52 }
 0x5aa   :  { %v892_v3 = vadd.f32 %v890_v2, %v4661_v49 }
 0x5ab   :  { %v897_v46 = vsel %vm313_vm3, %v893_v44, -inf }
 0x5ac   :  { %v894_v4 = vsel %vm313_vm3, %v892_v3, -inf }
 0x5b5   :  { %4258 = vrot.lane.b32.xlu1 %v4634_v41, %s5127_s2  ;;  %s5151_s2 = smov 40  }
 0x5b9   :  { %1086 = vrot.lane.b32.xlu1 %v4628_v40, %s5125_s27 }
 0x5bd   :  { %1088 = vrot.lane.b32.xlu1 %v4626_v38, %s5125_s27 }
 0x5e1   :  { %898 = vmax.xlane.f32.xlu1 %v897_v46 }
 0x631   :  { %v612_v47 = vpop.xlane.xlu1 %611 }
 0x632   :  { %v614_v48 = vsub.f32 %v606_v32, %v612_v47  ;;  %v609_v50 = vpop.xlane.xlu0 %608 }
 0x633   :  { %v613_v51 = vsub.f32 %v605_v34, %v609_v50 }
 0x634   :  { %v617_v53 = vmul.f32 1.442695, %v614_v48 }
 0x635   :  { %v615_v54 = vmul.f32 1.442695, %v613_v51  ;;  %v4259_v55 = vpop.permute.xlu1 %4258 }
 0x636   :  { %4324 = vpow2.f32 %v617_v53  ;;  %v4261_v56 = vunpack.i.h.bf16 %v4259_v55  ;;  %v4260_v57 = vunpack.i.l.bf16 %v4259_v55 }
 0x637   :  { %4326 = vpow2.f32 %v615_v54 }
 0x638   :  { %v4079_v40 = vpack.c.bf16 %v4261_v56, %v4260_v57 }
 0x639   :  { %v1087_v58 = vpop.permute.xlu1 %1086 }
 0x63a   :  { %4081 = vmatprep.subr.msk.bf16.mxu0 %vm4648_vm2, %v4079_v40  ;;  %3850 = vmatprep.mubr.msk.f32.mxu0 %vm225_vm1, %v1087_v58 }
 0x63b   :  { %4084 = vmatpush3.bf16.xpose.msk.msra.mxu0 %vm4648_vm2, %v4079_v40 }
 0x63d   :  { %v1089_v59 = vpop.permute.xlu1 %1088 }
 0x640   :  { %v4325_v38 = vpop.eup %4324 }
 0x641   :  { %v622_v60 = vsel %vm313_vm3, %v4325_v38, 0.0  ;;  %v4327_v61 = vpop.eup %4326 }
 0x642   :  { %3851 = vmatmul.mubr.msk.f32.vlgmr.msra.gmra.mrb[8].mxu0 %vm225_vm1, %v1089_v59  ;;  %623 = vadd.xlane.f32.xlu0 %v622_v60  ;;  %v619_v62 = vsel %vm313_vm3, %v4327_v61, 0.0  ;;  %v216_v59 = vld [vmem:[%s5101_s7 + $0x10] sm:$0xff] }
 0x646   :  { %620 = vadd.xlane.f32.xlu0 %v619_v62 }
 0x65c   :  { %4253 = vrot.lane.b32.xlu0 %v4634_v41, %s5123_s28  ;;  %s5149_s28 = smov 56  }
 0x66e   :  { %v899_v63 = vpop.xlane.xlu1 %898 }
 0x66f   :  { %v901_v0 = vsub.f32 %v893_v44, %v899_v63 }
 0x671   :  { %v904_v1 = vmul.f32 1.442695, %v901_v0 }
 0x673   :  { %4328 = vpow2.f32 %v904_v1 }
 0x67b   :  { %895 = vmax.xlane.f32.xlu0 %v894_v4 }
 0x67d   :  { %v4723_v5 = vpop.eup %4328 }
 0x67e   :  { %v909_v6 = vsel %vm313_vm3, %v4723_v5, 0.0 }
 0x67f   :  { %910 = vadd.xlane.f32.xlu0 %v909_v6  ;;  %v217_v6 = vld [vmem:[%s5101_s7 + $0x18] sm:$0xff] }
 0x6cf   :  { %v624_v7 = vpop.xlane.xlu0 %623 }
 0x6d0   :  { %4330 = vrcp.f32 %v624_v7 }
 0x6d3   :  { %v621_v8 = vpop.xlane.xlu0 %620 }
 0x6d4   :  { %4332 = vrcp.f32 %v621_v8 }
 0x6d7   :  { %v4254_v9 = vpop.permute.xlu0 %4253 }
 0x6d8   :  { %v4256_v10 = vunpack.i.h.bf16 %v4254_v9  ;;  %v4255_v11 = vunpack.i.l.bf16 %v4254_v9 }
 0x6da   :  { %v4065_v12 = vpack.c.bf16 %v4256_v10, %v4255_v11  ;;  %v4331_v13 = vpop.eup %4330  ;;  %v3519_v10 = vld [vmem:[%s5102_s8] ss:$0 sm:$0xff] }
 0x6db   :  { %v628_v16 = vmul.f32 %v4331_v13, %v4325_v38 }
 0x6dc   :  { %4066 = vmatprep.subr.bf16.mxu1 %v4065_v12 }
 0x6dd   :  { %4068 = vmatpush3.bf16.msra.mxu1 %v4065_v12 }
 0x6de   :  { %v4333_v14 = vpop.eup %4332  ;;  %3822 = vmatprep.subr.mxu1 %v215_v30 }
 0x6df   :  { %v627_v15 = vmul.f32 %v4333_v14, %v4327_v61 }
 0x6e1   :  { %3819 = vmatprep.mubr.msk.f32.mxu1 %vm313_vm3, %v627_v15 }
 0x6e2   :  { %3820 = vmatmul.mubr.msk.f32.vlgmr.msra.gmra.mrb[4].mxu1 %vm313_vm3, %v628_v16 }
 0x6e3   :  { %3823 = vmatpush3.msra.mxu1 %v215_v30  ;;  %v1421_v30 = vld [vmem:[%s5105_s11 + $0x10] sm:$0xff] }
 0x708   :  { %v896_v17 = vpop.xlane.xlu0 %895 }
 0x709   :  { %v900_v18 = vsub.f32 %v892_v3, %v896_v17 }
 0x70b   :  { %v902_v19 = vmul.f32 1.442695, %v900_v18 }
 0x70c   :  { %v911_v31 = vpop.xlane.xlu0 %910 }
 0x70d   :  { %4334 = vpow2.f32 %v902_v19 }
 0x715   :  { %v3852_v20 = vpop.f32.mrb[8].mxu0 }
 0x716   :  { %v1168_v21 = vpop.f32.mrb[9].mxu0  ;;  %v1178_v23 = vmul.f32 0.35355338, %v3852_v20 }
 0x717   :  { %v4335_v22 = vpop.eup %4334  ;;  %v1177_v24 = vmul.f32 0.35355338, %v1168_v21 }
 0x718   :  { %v906_v25 = vsel %vm313_vm3, %v4335_v22, 0.0  ;;  %v1180_v28 = vadd.f32 %v1178_v23, %v4666_v52 }
 0x719   :  { %907 = vadd.xlane.f32.xlu0 %v906_v25  ;;  %v1179_v26 = vadd.f32 %v1177_v24, %v4661_v49 }
 0x71a   :  { %v1184_v29 = vsel %vm313_vm3, %v1180_v28, -inf }
 0x71b   :  { %v1181_v27 = vsel %vm313_vm3, %v1179_v26, -inf }
 0x71c   :  { %1182 = vmax.xlane.f32.xlu1 %v1181_v27 }
 0x720   :  { %1185 = vmax.xlane.f32.xlu1 %v1184_v29 }
 0x72f   :  { %4263 = vrot.lane.b32.xlu0 %v4634_v41, %s5121_s23 }
 0x7a6   :  { %v908_v32 = vpop.xlane.xlu0 %907 }
 0x7a7   :  { %4336 = vrcp.f32 %v908_v32 }
 0x7a8   :  { %4338 = vrcp.f32 %v911_v31  ;;  %v1422_v31 = vld [vmem:[%s5105_s11 + $0x18] sm:$0xff] }
 0x7a9   :  { %v1183_v34 = vpop.xlane.xlu1 %1182  ;;  %v4093_v32 = vpack.c.bf16 %v1422_v31, %v1421_v30 }
 0x7aa   :  { %v4264_v36 = vpop.permute.xlu0 %4263  ;;  %v1187_v42 = vsub.f32 %v1179_v26, %v1183_v34 }
 0x7ab   :  { %v4266_v37 = vunpack.i.h.bf16 %v4264_v36  ;;  %v4265_v39 = vunpack.i.l.bf16 %v4264_v36 }
 0x7ac   :  { %v1189_v47 = vmul.f32 1.442695, %v1187_v42 }
 0x7ad   :  { %v4075_v43 = vpack.c.bf16 %v4266_v37, %v4265_v39  ;;  %v1186_v44 = vpop.xlane.xlu1 %1185 }
 0x7ae   :  { %v1188_v46 = vsub.f32 %v1180_v28, %v1186_v44  ;;  %v1420_v28 = vld [vmem:[%s5105_s11 + $0x8] sm:$0xff] }
 0x7af   :  { %4076 = vmatprep.subr.bf16.mxu1 %v4075_v43 }
 0x7b0   :  { %v1191_v48 = vmul.f32 1.442695, %v1188_v46  ;;  %v3544_v46 = vld [vmem:[%s5103_s9] ss:$0 sm:$0xff] }
 0x7b1   :  { %v4337_v50 = vpop.eup %4336 }
 0x7b2   :  { %4340 = vpow2.f32 %v1191_v48  ;;  %v4339_v54 = vpop.eup %4338  ;;  %v914_v55 = vmul.f32 %v4337_v50, %v4335_v22  ;;  %v3545_v48 = vld [vmem:[%s5104_s10] ss:$0 sm:$0xff] }
 0x7b3   :  { %4342 = vpow2.f32 %v1189_v47  ;;  %v915_v56 = vmul.f32 %v4339_v54, %v4723_v5 }
 0x7b5   :  { %v3821_v51 = vpop.f32.mrb[4].mxu1 }
 0x7b6   :  { %v707_v53 = vpop.f32.mrb[5].mxu1 }
 0x7b7   :  { %3824 = vmatprep.mubr.msk.f32.mxu1 %vm225_vm1, %v707_v53 }
 0x7b8   :  { %3825 = vmatmul.mubr.msk.f32.vlgmr.msra.gmra.mrb[2].mxu1 %vm225_vm1, %v3821_v51 }
 0x7b9   :  { %4078 = vmatpush3.bf16.msra.mxu1 %v4075_v43  ;;  %3838 = vmatprep.mubr.msk.f32.mxu1 %vm313_vm3, %v914_v55 }
 0x7ba   :  { %3841 = vmatprep.subr.mxu1 %v216_v59 }
 0x7bc   :  { %v4341_v57 = vpop.eup %4340  ;;  %3839 = vmatmul.mubr.msk.f32.vlgmr.msra.gmra.mrb[6].mxu1 %vm313_vm3, %v915_v56 }
 0x7bd   :  { %v1196_v40 = vsel %vm313_vm3, %v4341_v57, 0.0  ;;  %v4343_v58 = vpop.eup %4342  ;;  %3842 = vmatpush3.msra.mxu1 %v216_v59  ;;  %v1532_v59 = vld [vmem:[%s5107_s13 + $0x18] sm:$0xff] }
 0x7be   :  { %1197 = vadd.xlane.f32.xlu1 %v1196_v40  ;;  %v1193_v38 = vsel %vm313_vm3, %v4343_v58, 0.0  ;;  %v1530_v40 = vld [vmem:[%s5107_s13 + $0x8] sm:$0xff] }
 0x7c2   :  { %1194 = vadd.xlane.f32.xlu1 %v1193_v38  ;;  %v1531_v38 = vld [vmem:[%s5107_s13 + $0x10] sm:$0xff] }
 0x7d3   :  { %4268 = vrot.lane.b32.xlu1 %v4634_v41, %s5122_s29 }
 0x84b   :  { %v1198_v60 = vpop.xlane.xlu1 %1197 }
 0x84f   :  { %v1195_v61 = vpop.xlane.xlu1 %1194 }
 0x850   :  { %4344 = vrcp.f32 %v1195_v61  ;;  %v1533_v61 = vld [vmem:[%s5107_s13 + $0x20] sm:$0xff] }
 0x851   :  { %4346 = vrcp.f32 %v1198_v60  ;;  %v4101_v60 = vpack.c.bf16 %v1532_v59, %v1531_v38 }
 0x853   :  { %v4269_v62 = vpop.permute.xlu1 %4268 }
 0x854   :  { %v4271_v63 = vunpack.i.h.bf16 %v4269_v62  ;;  %v4270_v0 = vunpack.i.l.bf16 %v4269_v62  ;;  %v1534_v62 = vld [vmem:[%s5107_s13 + $0x28] sm:$0xff] }
 0x856   :  { %v4085_v1 = vpack.c.bf16 %v4271_v63, %v4270_v0  ;;  %v4105_v63 = vpack.c.bf16 %v1534_v62, %v1533_v61  ;;  %v1535_v0 = vld [vmem:[%s5107_s13 + $0x30] sm:$0xff]  ;;  %v3552_v61 = vld [vmem:[%s5109_s15] ss:$0 sm:$0xff] }
 0x858   :  { %4086 = vmatprep.subr.bf16.mxu1 %v4085_v1 }
 0x85a   :  { %v4345_v2 = vpop.eup %4344 }
 0x85b   :  { %v4347_v5 = vpop.eup %4346  ;;  %v1201_v41 = vmul.f32 %v4345_v2, %v4343_v58 }
 0x85c   :  { %v1202_v7 = vmul.f32 %v4347_v5, %v4341_v57  ;;  %v1529_v57 = vld [vmem:[%s5107_s13] sm:$0xff] }
 0x85d   :  { %v4097_v58 = vpack.c.bf16 %v1530_v40, %v1529_v57 }
 0x88f   :  { %v3840_v3 = vpop.f32.mrb[6].mxu1 }
 0x890   :  { %v994_v4 = vpop.f32.mrb[7].mxu1 }
 0x891   :  { %3843 = vmatprep.mubr.msk.f32.mxu1 %vm225_vm1, %v994_v4 }
 0x892   :  { %3844 = vmatmul.mubr.msk.f32.vlgmr.msra.gmra.mrb[2].mxu1 %vm225_vm1, %v3840_v3  ;;  %v3546_v3 = vld [vmem:[%s5106_s12] ss:$0 sm:$0xff] }
 0x893   :  { %4088 = vmatpush3.bf16.msra.mxu1 %v4085_v1  ;;  %3857 = vmatprep.mubr.msk.f32.mxu1 %vm313_vm3, %v1201_v41  ;;  %v1536_v1 = vld [vmem:[%s5107_s13 + $0x38] sm:$0xff] }
 0x894   :  { %3860 = vmatprep.subr.mxu1 %v217_v6  ;;  %v4109_v2 = vpack.c.bf16 %v1536_v1, %v1535_v0 }
 0x896   :  { %3858 = vmatmul.mubr.msk.f32.vlgmr.msra.gmra.mrb[8].mxu1 %vm313_vm3, %v1202_v7 }
 0x897   :  { %3861 = vmatpush3.msra.mxu1 %v217_v6 }
 0x898   :  { %4098 = vmatprep.subr.bf16.mxu1 %v4097_v58 }
 0x969   :  { %v3859_v8 = vpop.f32.mrb[8].mxu1 }
 0x96a   :  { %v1281_v9 = vpop.f32.mrb[9].mxu1 }
 0x96b   :  { %3862 = vmatprep.mubr.msk.f32.mxu1 %vm225_vm1, %v1281_v9 }
 0x96c   :  { %3863 = vmatmul.mubr.msk.f32.vlgmr.msra.gmra.mrb[2].mxu1 %vm225_vm1, %v3859_v8 }
 0x96d   :  { %4100 = vmatpush3.bf16.msra.mxu1 %v4097_v58 }
 0x96e   :  { %4102 = vmatprep.subr.bf16.mxu1 %v4101_v60 }
 0x971   :  { %4104 = vmatpush3.bf16.msra.mxu1 %v4101_v60 }
 0x972   :  { %4106 = vmatprep.subr.bf16.mxu1 %v4105_v63 }
 0x975   :  { %4108 = vmatpush3.bf16.msra.mxu1 %v4105_v63  ;;  %v3553_v63 = vld [vmem:[%s5110_s16] ss:$0 sm:$0xff] }
 0x976   :  { %4110 = vmatprep.subr.bf16.mxu1 %v4109_v2 }
 0x979   :  { %4112 = vmatpush3.bf16.msra.mxu1 %v4109_v2 }
 0xa3f   :  { %v3864_v11 = vpop.f32.mrb[2].mxu1 }
 0xa40   :  { %v4200_v12 = vadd.f32 %v3864_v11, %v3519_v10  ;;  %v1362_v13 = vpop.f32.mrb[3].mxu1 }
 0xa41   :  { %v4201_v14 = vadd.f32 %v3519_v10, %v1362_v13 }
 0xa42   :  { %v1374_v15 = vadd.f32 %v4200_v12, %v4619_v35 }
 0xa43   :  { %v1373_v16 = vadd.f32 %v4201_v14, %v4615_v33  ;;  %v1419_v33 = vld [vmem:[%s5105_s11] sm:$0xff] }
 0xa44   :  { %v1380_v17 = vsel %vm76_vm0, %v1374_v15, 0.0  ;;  %v4089_v29 = vpack.c.bf16 %v1420_v28, %v1419_v33 }
 0xa45   :  { %1381 = vadd.xlane.f32.xlu1 %v1380_v17  ;;  %v1377_v18 = vsel %vm76_vm0, %v1373_v16, 0.0 }
 0xa46   :  { %1378 = vadd.xlane.f32.xlu0 %v1377_v18  ;;  %4090 = vmatprep.subr.bf16.mxu0 %v4089_v29 }
 0xa47   :  { %4092 = vmatpush3.bf16.msra.mxu0 %v4089_v29 }
 0xa48   :  { %4094 = vmatprep.subr.bf16.mxu0 %v4093_v32 }
 0xa4b   :  { %4096 = vmatpush3.bf16.msra.mxu0 %v4093_v32 }
 0xad2   :  { %v1382_v19 = vpop.xlane.xlu1 %1381 }
 0xad3   :  { %v1384_v20 = vmul.f32 0.03125, %v1382_v19  ;;  %v1379_v21 = vpop.xlane.xlu0 %1378 }
 0xad4   :  { %v1383_v22 = vmul.f32 0.03125, %v1379_v21 }
 0xad5   :  { %v1386_v23 = vsub.f32 %v1374_v15, %v1384_v20 }
 0xad6   :  { %v1385_v24 = vsub.f32 %v1373_v16, %v1383_v22 }
 0xad7   :  { %v1388_v27 = vmul.f32 %v1386_v23, %v1386_v23 }
 0xad8   :  { %v1387_v25 = vmul.f32 %v1385_v24, %v1385_v24 }
 0xad9   :  { %v1392_v35 = vsel %vm76_vm0, %v1388_v27, 0.0 }
 0xada   :  { %v1389_v26 = vsel %vm76_vm0, %v1387_v25, 0.0  ;;  %v3549_v25 = vld [vmem:[%s5108_s14] ss:$0 sm:$0xff] }
 0xadb   :  { %1390 = vadd.xlane.f32.xlu0 %v1389_v26 }
 0xadf   :  { %1393 = vadd.xlane.f32.xlu0 %v1392_v35 }
 0xb68   :  { %v1391_v34 = vpop.xlane.xlu0 %1390 }
 0xb69   :  { %v1395_v36 = vmul.f32 0.03125, %v1391_v34 }
 0xb6b   :  { %v1397_v37 = vadd.f32 1e-12, %v1395_v36 }
 0xb6c   :  { %v1394_v39 = vpop.xlane.xlu0 %1393 }
 0xb6d   :  { %4348 = vrsqrt.f32 %v1397_v37  ;;  %v1396_v42 = vmul.f32 0.03125, %v1394_v39 }
 0xb6f   :  { %v1398_v43 = vadd.f32 1e-12, %v1396_v42 }
 0xb71   :  { %4350 = vrsqrt.f32 %v1398_v43 }
 0xb77   :  { %v4349_v44 = vpop.eup %4348 }
 0xb78   :  { %v1401_v47 = vmul.f32 %v4349_v44, %v1385_v24 }
 0xb7a   :  { %v1409_v50 = vmul.f32 %v3544_v46, %v1401_v47 }
 0xb7b   :  { %v4351_v51 = vpop.eup %4350 }
 0xb7c   :  { %v1402_v53 = vmul.f32 %v4351_v51, %v1386_v23  ;;  %v1417_v54 = vadd.f32 %v3545_v48, %v1409_v50  ;;  %v3555_v50 = vld [vmem:[%s5138_s1 + $0x28] sm:$0xff] }
 0xb7e   :  { %v1410_v55 = vmul.f32 %v3544_v46, %v1402_v53  ;;  %3873 = vmatprep.mubr.msk.f32.mxu0 %vm76_vm0, %v1417_v54  ;;  %v3556_v53 = vld [vmem:[%s5138_s1 + $0x30] sm:$0xff] }
 0xb80   :  { %v1418_v56 = vadd.f32 %v3545_v48, %v1410_v55  ;;  %v3554_v48 = vld [vmem:[%s5138_s1 + $0x20] sm:$0xff] }
 0xb81   :  { %v4113_v51 = vpack.c.bf16 %v3555_v50, %v3554_v48 }
 0xb82   :  { %3874 = vmatmul.mubr.msk.f32.vlgmr.msra.gmra.mrb[10].mxu0 %vm76_vm0, %v1418_v56 }
 0xb83   :  { %4114 = vmatprep.subr.bf16.mxu0 %v4113_v51 }
 0xb84   :  { %4116 = vmatpush3.bf16.msra.mxu0 %v4113_v51 }
 0xc55   :  { %v3875_v4 = vpop.f32.mrb[10].mxu0 }
 0xc56   :  { %v1508_v5 = vadd.f32 %v3875_v4, %v3546_v3  ;;  %v1502_v41 = vpop.f32.mrb[11].mxu0 }
 0xc57   :  { %v1503_v6 = vadd.f32 %v3546_v3, %v1502_v41  ;;  %v3559_v41 = vld [vmem:[%s5141_s5 + $0x1] ss:$0 sm:$0xff]  ;;  %s5145_s5 = smov 112  }
 0xc58   :  { %v1512_v7 = vmul.f32 %v1508_v5, %v1508_v5 }
 0xc59   :  { %v1511_v8 = vmul.f32 %v1503_v6, %v1503_v6 }
 0xc5a   :  { %v1514_v9 = vmul.f32 %v1512_v7, %v1508_v5 }
 0xc5b   :  { %v1513_v10 = vmul.f32 %v1511_v8, %v1503_v6 }
 0xc5c   :  { %v1516_v11 = vmul.f32 0.044715, %v1514_v9 }
 0xc5d   :  { %v1515_v12 = vmul.f32 0.044715, %v1513_v10 }
 0xc5e   :  { %v1518_v13 = vadd.f32 %v1516_v11, %v1508_v5 }
 0xc5f   :  { %v1517_v14 = vadd.f32 %v1515_v12, %v1503_v6 }
 0xc60   :  { %v1520_v15 = vmul.f32 0.7978846, %v1518_v13 }
 0xc61   :  { %v1519_v16 = vmul.f32 0.7978846, %v1517_v14 }
 0xc62   :  { %4352 = vtanh.f32 %v1520_v15 }
 0xc63   :  { %4354 = vtanh.f32 %v1519_v16 }
 0xc6c   :  { %v4353_v17 = vpop.eup %4352 }
 0xc6d   :  { %v4355_v18 = vpop.eup %4354  ;;  %v1524_v19 = vadd.f32 1.0, %v4353_v17 }
 0xc6e   :  { %v1523_v20 = vadd.f32 1.0, %v4355_v18 }
 0xc6f   :  { %v1526_v21 = vmul.f32 0.5, %v1524_v19 }
 0xc70   :  { %v1525_v22 = vmul.f32 0.5, %v1523_v20 }
 0xc71   :  { %v1528_v24 = vmul.f32 %v1526_v21, %v1508_v5 }
 0xc72   :  { %v1527_v23 = vmul.f32 %v1525_v22, %v1503_v6 }
 0xc74   :  { %3892 = vmatprep.mubr.msk.f32.mxu1 %vm1544_vm4, %v1527_v23 }
 0xc75   :  { %3893 = vmatmul.mubr.msk.f32.vlgmr.msra.gmra.mrb[10].mxu1 %vm1544_vm4, %v1528_v24 }
 0xd48   :  { %v3894_v26 = vpop.f32.mrb[10].mxu1 }
 0xd49   :  { %v1617_v27 = vpop.f32.mrb[11].mxu1  ;;  %v1623_v35 = vadd.f32 %v3894_v26, %v3549_v25 }
 0xd4a   :  { %v1618_v33 = vadd.f32 %v3549_v25, %v1617_v27 }
 0xd4b   :  { %v1627_v30 = vadd.f32 %v1623_v35, %v1418_v56 }
 0xd4c   :  { %v1626_v28 = vadd.f32 %v1618_v33, %v1417_v54  ;;  %v3557_v54 = vld [vmem:[%s5138_s1 + $0x38] sm:$0xff]  ;;  %s5150_s1 = smov 48  }
 0xd4d   :  { %v1633_v31 = vsel %vm76_vm0, %v1627_v30, 0.0  ;;  %v4117_v55 = vpack.c.bf16 %v3557_v54, %v3556_v53 }
 0xd4e   :  { %v1630_v29 = vsel %vm76_vm0, %v1626_v28, 0.0 }
 0xd4f   :  { %1631 = vadd.xlane.f32.xlu0 %v1630_v29  ;;  %4118 = vmatprep.subr.bf16.mxu0 %v4117_v55 }
 0xd50   :  { %4120 = vmatpush3.bf16.msra.mxu0 %v4117_v55 }
 0xd53   :  { %1634 = vadd.xlane.f32.xlu0 %v1633_v31 }
 0xddc   :  { %v1632_v32 = vpop.xlane.xlu0 %1631 }
 0xddd   :  { %v1636_v34 = vmul.f32 0.03125, %v1632_v32 }
 0xddf   :  { %v1638_v36 = vsub.f32 %v1626_v28, %v1636_v34 }
 0xde0   :  { %v1635_v37 = vpop.xlane.xlu0 %1634 }
 0xde1   :  { %v1637_v39 = vmul.f32 0.03125, %v1635_v37  ;;  %v1640_v42 = vmul.f32 %v1638_v36, %v1638_v36 }
 0xde3   :  { %v1639_v43 = vsub.f32 %v1627_v30, %v1637_v39  ;;  %v1642_v44 = vsel %vm76_vm0, %v1640_v42, 0.0 }
 0xde4   :  { %1643 = vadd.xlane.f32.xlu0 %v1642_v44 }
 0xde5   :  { %v1641_v46 = vmul.f32 %v1639_v43, %v1639_v43 }
 0xde7   :  { %v1645_v47 = vsel %vm76_vm0, %v1641_v46, 0.0 }
 0xde8   :  { %1646 = vadd.xlane.f32.xlu1 %v1645_v47 }
 0xe71   :  { %v1644_v56 = vpop.xlane.xlu0 %1643 }
 0xe72   :  { %v1648_v57 = vmul.f32 0.03125, %v1644_v56 }
 0xe74   :  { %v1650_v40 = vadd.f32 1e-12, %v1648_v57 }
 0xe75   :  { %v1647_v58 = vpop.xlane.xlu1 %1646 }
 0xe76   :  { %4356 = vrsqrt.f32 %v1650_v40  ;;  %v1649_v38 = vmul.f32 0.03125, %v1647_v58 }
 0xe78   :  { %v1651_v59 = vadd.f32 1e-12, %v1649_v38 }
 0xe7a   :  { %4358 = vrsqrt.f32 %v1651_v59 }
 0xe80   :  { %v4357_v60 = vpop.eup %4356 }
 0xe81   :  { %v1654_v62 = vmul.f32 %v4357_v60, %v1638_v36 }
 0xe83   :  { %v1662_v0 = vmul.f32 %v3552_v61, %v1654_v62 }
 0xe84   :  { %v4359_v1 = vpop.eup %4358 }
 0xe85   :  { %v1655_v2 = vmul.f32 %v4359_v1, %v1639_v43  ;;  %v4843_v3 = vadd.f32 %v3553_v63, %v1662_v0 }
 0xe87   :  { %v1663_v4 = vmul.f32 %v3552_v61, %v1655_v2  ;;  %3903 = vmatprep.mubr.msk.f32.mxu0 %vm76_vm0, %v4843_v3 }
 0xe89   :  { %v4847_v5 = vadd.f32 %v3553_v63, %v1663_v4 }
 0xe8b   :  { %3904 = vmatmul.mubr.msk.f32.vlgmr.msra.gmra.mrb[12].mxu0 %vm76_vm0, %v4847_v5 }
 0xf5e   :  { %v3905_v6 = vpop.f32.mrb[12].mxu0 }
 0xf5f   :  { %v1763_v7 = vadd.f32 %v3905_v6, %v3559_v41  ;;  %v1757_v8 = vpop.f32.mrb[13].mxu0 }
 0xf60   :  { %v1758_v9 = vadd.f32 %v3559_v41, %v1757_v8 }
 0xf62   :  { %3910 = vmatprep.mubr.msk.f32.mxu0 %vm225_vm1, %v1758_v9  ;;  %v4855_v10 = vpack.i.bf16 %v1763_v7, %v1758_v9 }
 0xf64   :  { %4278 = vrot.lane.b32.xlu1 %v4855_v10, %s4457_s6  ;;  %4273 = vrot.lane.b32.xlu0 %v4855_v10, %s4456_s24  ;;  %s5146_s24 = smov 72   ;;  %s5147_s6 = smov 104  }
 0xf68   :  { %2064 = vrot.lane.b32.xlu1 %v1758_v9, %s4458_s25 }
 0xf6c   :  { %2066 = vrot.lane.b32.xlu1 %v1763_v7, %s4458_s25  ;;  %s5148_s25 = smov 64  }
 0xfd6   :  { %v4279_v11 = vpop.permute.xlu1 %4278  ;;  %v4274_v12 = vpop.permute.xlu0 %4273 }
 0xfd7   :  { %v4281_v13 = vunpack.i.h.bf16 %v4279_v11  ;;  %v4280_v14 = vunpack.i.l.bf16 %v4279_v11  ;;  %v4276_v15 = vunpack.i.h.bf16 %v4274_v12  ;;  %v4275_v16 = vunpack.i.l.bf16 %v4274_v12 }
 0xfd9   :  { %v4121_v17 = vpack.c.bf16 %v4276_v15, %v4275_v16  ;;  %v4131_v18 = vpack.c.bf16 %v4281_v13, %v4280_v14 }
 0xfda   :  { %v2065_v19 = vpop.permute.xlu1 %2064 }
 0xfdb   :  { %4123 = vmatprep.subr.msk.bf16.mxu0 %vm4648_vm2, %v4121_v17 }
 0xfdc   :  { %4126 = vmatpush3.bf16.xpose.msk.msra.mxu0 %vm4648_vm2, %v4121_v17 }
 0xfdd   :  { %4133 = vmatprep.subr.msk.bf16.mxu0 %vm4648_vm2, %v4131_v18 }
 0xfde   :  { %v2067_v20 = vpop.permute.xlu1 %2066 }
 0xfe3   :  { %3911 = vmatmul.mubr.msk.f32.vlgmr.msra.gmra.mrb[14].mxu0 %vm225_vm1, %v1763_v7 }
 0xfe4   :  { %4136 = vmatpush3.bf16.xpose.msk.msra.mxu0 %vm4648_vm2, %v4131_v18  ;;  %3929 = vmatprep.mubr.msk.f32.mxu0 %vm225_vm1, %v2065_v19 }
 0xfeb   :  { %3930 = vmatmul.mubr.msk.f32.vlgmr.msra.gmra.mrb[16].mxu0 %vm225_vm1, %v2067_v20 }
0x10b6   :  { %v3912_v21 = vpop.f32.mrb[14].mxu0 }
0x10b7   :  { %v1863_v22 = vmul.f32 0.35355338, %v3912_v21  ;;  %v1853_v23 = vpop.f32.mrb[15].mxu0  ;;  %v4406_v21 = vld [vmem:[%s5144_s3 + $0x8] sm:$0xff] }
0x10b8   :  { %v1862_v24 = vmul.f32 0.35355338, %v1853_v23 }
0x10b9   :  { %v1865_v25 = vadd.f32 %v1863_v22, %v4666_v52 }
0x10ba   :  { %v1864_v26 = vadd.f32 %v1862_v24, %v4661_v49  ;;  %v3562_v24 = vld [vmem:[%s5101_s7 + $0x20] sm:$0xff] }
0x10bb   :  { %v1869_v27 = vsel %vm313_vm3, %v1865_v25, -inf }
0x10bc   :  { %1870 = vmax.xlane.f32.xlu1 %v1869_v27  ;;  %v1866_v35 = vsel %vm313_vm3, %v1864_v26, -inf }
0x10bd   :  { %1867 = vmax.xlane.f32.xlu0 %v1866_v35 }
0x10be   :  { %v3931_v33 = vpop.f32.mrb[16].mxu0 }
0x10bf   :  { %v2146_v28 = vpop.f32.mrb[17].mxu0  ;;  %v2156_v29 = vmul.f32 0.35355338, %v3931_v33 }
0x10c0   :  { %v2155_v40 = vmul.f32 0.35355338, %v2146_v28 }
0x10c1   :  { %v2158_v30 = vadd.f32 %v2156_v29, %v4666_v52 }
0x10c2   :  { %v2157_v62 = vadd.f32 %v2155_v40, %v4661_v49 }
0x10c3   :  { %v2162_v31 = vsel %vm313_vm3, %v2158_v30, -inf }
0x10c4   :  { %v2159_v63 = vsel %vm313_vm3, %v2157_v62, -inf }
0x10cd   :  { %4288 = vrot.lane.b32.xlu1 %v4855_v10, %s4461_s4  ;;  %s5152_s4 = sld [smem:[#allocation10_spill]] }
0x10d1   :  { %2351 = vrot.lane.b32.xlu1 %v1758_v9, %s5145_s5 }
0x10d5   :  { %2353 = vrot.lane.b32.xlu1 %v1763_v7, %s5145_s5 }
0x10f9   :  { %2163 = vmax.xlane.f32.xlu1 %v2162_v31 }
0x110a   :  { %4298 = vrot.lane.b32.xlu1 %v4855_v10, %s5146_s24 }
0x110e   :  { %2638 = vrot.lane.b32.xlu1 %v1758_v9, %s5147_s6 }
0x1112   :  { %2640 = vrot.lane.b32.xlu1 %v1763_v7, %s5147_s6 }
0x1149   :  { %v1871_v32 = vpop.xlane.xlu1 %1870 }
0x114a   :  { %v1873_v34 = vsub.f32 %v1865_v25, %v1871_v32  ;;  %v1868_v36 = vpop.xlane.xlu0 %1867 }
0x114b   :  { %v1872_v37 = vsub.f32 %v1864_v26, %v1868_v36  ;;  %v4407_v26 = vld [vmem:[%s5144_s3] sm:$0xff] }
0x114c   :  { %v1876_v39 = vmul.f32 1.442695, %v1873_v34 }
0x114d   :  { %v1874_v42 = vmul.f32 1.442695, %v1872_v37  ;;  %v4289_v43 = vpop.permute.xlu1 %4288 }
0x114e   :  { %4360 = vpow2.f32 %v1876_v39  ;;  %v4291_v44 = vunpack.i.h.bf16 %v4289_v43  ;;  %v4290_v52 = vunpack.i.l.bf16 %v4289_v43 }
0x114f   :  { %4362 = vpow2.f32 %v1874_v42 }
0x1150   :  { %v4141_v46 = vpack.c.bf16 %v4291_v44, %v4290_v52 }
0x1151   :  { %v2352_v47 = vpop.permute.xlu1 %2351 }
0x1152   :  { %4143 = vmatprep.subr.msk.bf16.mxu0 %vm4648_vm2, %v4141_v46  ;;  %3948 = vmatprep.mubr.msk.f32.mxu0 %vm225_vm1, %v2352_v47 }
0x1153   :  { %4146 = vmatpush3.bf16.xpose.msk.msra.mxu0 %vm4648_vm2, %v4141_v46 }
0x1155   :  { %v2354_v50 = vpop.permute.xlu1 %2353 }
0x1158   :  { %v4361_v48 = vpop.eup %4360 }
0x1159   :  { %v1881_v51 = vsel %vm313_vm3, %v4361_v48, 0.0  ;;  %v4363_v53 = vpop.eup %4362 }
0x115a   :  { %3949 = vmatmul.mubr.msk.f32.vlgmr.msra.gmra.mrb[18].mxu0 %vm225_vm1, %v2354_v50  ;;  %1882 = vadd.xlane.f32.xlu0 %v1881_v51  ;;  %v1878_v54 = vsel %vm313_vm3, %v4363_v53, 0.0 }
0x115e   :  { %1879 = vadd.xlane.f32.xlu0 %v1878_v54 }
0x1174   :  { %4283 = vrot.lane.b32.xlu0 %v4855_v10, %s5148_s25 }
0x1186   :  { %v2164_v55 = vpop.xlane.xlu1 %2163 }
0x1187   :  { %v2166_v56 = vsub.f32 %v2158_v30, %v2164_v55 }
0x1189   :  { %v2169_v57 = vmul.f32 1.442695, %v2166_v56 }
0x118a   :  { %v4299_v58 = vpop.permute.xlu1 %4298 }
0x118b   :  { %4364 = vpow2.f32 %v2169_v57  ;;  %v4301_v38 = vunpack.i.h.bf16 %v4299_v58  ;;  %v4300_v59 = vunpack.i.l.bf16 %v4299_v58 }
0x118d   :  { %v4151_v60 = vpack.c.bf16 %v4301_v38, %v4300_v59 }
0x118e   :  { %v2639_v61 = vpop.permute.xlu1 %2638 }
0x118f   :  { %4153 = vmatprep.subr.msk.bf16.mxu0 %vm4648_vm2, %v4151_v60  ;;  %3967 = vmatprep.mubr.msk.f32.mxu0 %vm225_vm1, %v2639_v61 }
0x1190   :  { %4156 = vmatpush3.bf16.xpose.msk.msra.mxu0 %vm4648_vm2, %v4151_v60 }
0x1192   :  { %v2641_v1 = vpop.permute.xlu1 %2640 }
0x1193   :  { %2160 = vmax.xlane.f32.xlu0 %v2159_v63 }
0x1195   :  { %v4905_v0 = vpop.eup %4364 }
0x1196   :  { %v2174_v2 = vsel %vm313_vm3, %v4905_v0, 0.0 }
0x1197   :  { %3968 = vmatmul.mubr.msk.f32.vlgmr.msra.gmra.mrb[20].mxu0 %vm225_vm1, %v2641_v1  ;;  %2175 = vadd.xlane.f32.xlu0 %v2174_v2 }
0x11e7   :  { %v1883_v49 = vpop.xlane.xlu0 %1882 }
0x11e8   :  { %4366 = vrcp.f32 %v1883_v49 }
0x11eb   :  { %v1880_v4 = vpop.xlane.xlu0 %1879 }
0x11ec   :  { %4368 = vrcp.f32 %v1880_v4 }
0x11ef   :  { %v4284_v41 = vpop.permute.xlu0 %4283 }
0x11f0   :  { %v4286_v6 = vunpack.i.h.bf16 %v4284_v41  ;;  %v4285_v45 = vunpack.i.l.bf16 %v4284_v41 }
0x11f2   :  { %v4127_v7 = vpack.c.bf16 %v4286_v6, %v4285_v45  ;;  %v4367_v8 = vpop.eup %4366 }
0x11f3   :  { %v1887_v12 = vmul.f32 %v4367_v8, %v4361_v48 }
0x11f4   :  { %4128 = vmatprep.subr.bf16.mxu1 %v4127_v7 }
0x11f5   :  { %4130 = vmatpush3.bf16.msra.mxu1 %v4127_v7  ;;  %v3563_v7 = vld [vmem:[%s5101_s7 + $0x28] sm:$0xff] }
0x11f6   :  { %v4369_v9 = vpop.eup %4368  ;;  %3920 = vmatprep.subr.mxu1 %v3562_v24 }
0x11f7   :  { %v1886_v11 = vmul.f32 %v4369_v9, %v4363_v53 }
0x11f9   :  { %3917 = vmatprep.mubr.msk.f32.mxu1 %vm313_vm3, %v1886_v11 }
0x11fa   :  { %3918 = vmatmul.mubr.msk.f32.vlgmr.msra.gmra.mrb[12].mxu1 %vm313_vm3, %v1887_v12 }
0x11fb   :  { %3921 = vmatpush3.msra.mxu1 %v3562_v24 }
0x1220   :  { %v2161_v13 = vpop.xlane.xlu0 %2160 }
0x1221   :  { %v2165_v14 = vsub.f32 %v2157_v62, %v2161_v13 }
0x1223   :  { %v2167_v15 = vmul.f32 1.442695, %v2165_v14 }
0x1224   :  { %v2176_v37 = vpop.xlane.xlu0 %2175 }
0x1225   :  { %4370 = vpow2.f32 %v2167_v15 }
0x122d   :  { %v3950_v16 = vpop.f32.mrb[18].mxu0 }
0x122e   :  { %v2443_v17 = vmul.f32 0.35355338, %v3950_v16  ;;  %v2433_v18 = vpop.f32.mrb[19].mxu0 }
0x122f   :  { %v4371_v19 = vpop.eup %4370  ;;  %v2442_v25 = vmul.f32 0.35355338, %v2433_v18 }
0x1230   :  { %v2171_v20 = vsel %vm313_vm3, %v4371_v19, 0.0  ;;  %v2445_v22 = vadd.f32 %v4406_v21, %v2443_v17 }
0x1231   :  { %2172 = vadd.xlane.f32.xlu0 %v2171_v20  ;;  %v2444_v27 = vadd.f32 %v4407_v26, %v2442_v25 }
0x1232   :  { %v2449_v23 = vsel %vm313_vm3, %v2445_v22, -inf }
0x1233   :  { %2450 = vmax.xlane.f32.xlu1 %v2449_v23  ;;  %v2446_v35 = vsel %vm313_vm3, %v2444_v27, -inf }
0x1247   :  { %4293 = vrot.lane.b32.xlu0 %v4855_v10, %s5149_s28 }
0x1266   :  { %2447 = vmax.xlane.f32.xlu0 %v2446_v35 }
0x126a   :  { %v3969_v33 = vpop.f32.mrb[20].mxu0 }
0x126b   :  { %v2720_v28 = vpop.f32.mrb[21].mxu0  ;;  %v2730_v29 = vmul.f32 0.35355338, %v3969_v33 }
0x126c   :  { %v2729_v30 = vmul.f32 0.35355338, %v2720_v28 }
0x126d   :  { %v2732_v34 = vadd.f32 %v4406_v21, %v2730_v29 }
0x126e   :  { %v2731_v31 = vadd.f32 %v4407_v26, %v2729_v30  ;;  %v3565_v30 = vld [vmem:[%s5101_s7 + $0x38] sm:$0xff] }
0x126f   :  { %v2736_v36 = vsel %vm313_vm3, %v2732_v34, -inf }
0x1270   :  { %v2733_v32 = vsel %vm313_vm3, %v2731_v31, -inf }
0x1271   :  { %2734 = vmax.xlane.f32.xlu1 %v2733_v32 }
0x1275   :  { %2737 = vmax.xlane.f32.xlu1 %v2736_v36  ;;  %v3575_v36 = vld [vmem:[%s5102_s8 + $0x1] ss:$0 sm:$0xff] }
0x12be   :  { %v2173_v39 = vpop.xlane.xlu0 %2172 }
0x12bf   :  { %4372 = vrcp.f32 %v2173_v39 }
0x12c0   :  { %v2451_v42 = vpop.xlane.xlu1 %2450  ;;  %4374 = vrcp.f32 %v2176_v37 }
0x12c1   :  { %v2453_v43 = vsub.f32 %v2445_v22, %v2451_v42 }
0x12c2   :  { %v4294_v44 = vpop.permute.xlu0 %4293 }
0x12c3   :  { %v2456_v52 = vmul.f32 1.442695, %v2453_v43  ;;  %v4296_v46 = vunpack.i.h.bf16 %v4294_v44  ;;  %v4295_v47 = vunpack.i.l.bf16 %v4294_v44 }
0x12c5   :  { %4376 = vpow2.f32 %v2456_v52  ;;  %v4137_v48 = vpack.c.bf16 %v4296_v46, %v4295_v47 }
0x12c7   :  { %4138 = vmatprep.subr.bf16.mxu1 %v4137_v48 }
0x12c9   :  { %v4373_v50 = vpop.eup %4372 }
0x12ca   :  { %v4375_v53 = vpop.eup %4374  ;;  %v2179_v57 = vmul.f32 %v4373_v50, %v4371_v19 }
0x12cb   :  { %v2180_v40 = vmul.f32 %v4375_v53, %v4905_v0 }
0x12cd   :  { %v3919_v51 = vpop.f32.mrb[12].mxu1 }
0x12ce   :  { %v1966_v54 = vpop.f32.mrb[13].mxu1 }
0x12cf   :  { %v4377_v55 = vpop.eup %4376  ;;  %3922 = vmatprep.mubr.msk.f32.mxu1 %vm225_vm1, %v1966_v54 }
0x12d0   :  { %3923 = vmatmul.mubr.msk.f32.vlgmr.msra.gmra.mrb[14].mxu1 %vm225_vm1, %v3919_v51  ;;  %v2461_v56 = vsel %vm313_vm3, %v4377_v55, 0.0 }
0x12d1   :  { %4140 = vmatpush3.bf16.msra.mxu1 %v4137_v48  ;;  %2462 = vadd.xlane.f32.xlu0 %v2461_v56 }
0x12d2   :  { %3936 = vmatprep.mubr.msk.f32.mxu1 %vm313_vm3, %v2179_v57  ;;  %3939 = vmatprep.subr.mxu1 %v3563_v7 }
0x12d4   :  { %3937 = vmatmul.mubr.msk.f32.vlgmr.msra.gmra.mrb[16].mxu1 %vm313_vm3, %v2180_v40 }
0x12d5   :  { %3940 = vmatpush3.msra.mxu1 %v3563_v7 }
0x12f3   :  { %v2448_v58 = vpop.xlane.xlu0 %2447 }
0x12f4   :  { %v2452_v38 = vsub.f32 %v2444_v27, %v2448_v58  ;;  %v3605_v58 = vld [vmem:[%s5105_s11 + $0x28] sm:$0xff] }
0x12f6   :  { %v2454_v59 = vmul.f32 1.442695, %v2452_v38 }
0x12f8   :  { %4378 = vpow2.f32 %v2454_v59  ;;  %v3606_v59 = vld [vmem:[%s5105_s11 + $0x30] sm:$0xff] }
0x12fe   :  { %v2735_v60 = vpop.xlane.xlu1 %2734 }
0x12ff   :  { %v2739_v61 = vsub.f32 %v2731_v31, %v2735_v60  ;;  %v3607_v60 = vld [vmem:[%s5105_s11 + $0x38] sm:$0xff] }
0x1301   :  { %v2741_v49 = vmul.f32 1.442695, %v2739_v61  ;;  %v4165_v61 = vpack.c.bf16 %v3607_v60, %v3606_v59 }
0x1302   :  { %v4379_v62 = vpop.eup %4378  ;;  %v2738_v63 = vpop.xlane.xlu1 %2737 }
0x1303   :  { %v2740_v1 = vsub.f32 %v2732_v34, %v2738_v63  ;;  %v2458_v2 = vsel %vm313_vm3, %v4379_v62, 0.0 }
0x1304   :  { %2459 = vadd.xlane.f32.xlu0 %v2458_v2 }
0x1305   :  { %v2743_v4 = vmul.f32 1.442695, %v2740_v1 }
0x1307   :  { %4380 = vpow2.f32 %v2743_v4 }
0x1308   :  { %4382 = vpow2.f32 %v2741_v49 }
0x1311   :  { %v4381_v0 = vpop.eup %4380 }
0x1312   :  { %v2748_v41 = vsel %vm313_vm3, %v4381_v0, 0.0  ;;  %v4383_v6 = vpop.eup %4382 }
0x1313   :  { %2749 = vadd.xlane.f32.xlu1 %v2748_v41  ;;  %v2745_v45 = vsel %vm313_vm3, %v4383_v6, 0.0  ;;  %v3602_v41 = vld [vmem:[%s5103_s9 + $0x1] ss:$0 sm:$0xff] }
0x1317   :  { %2746 = vadd.xlane.f32.xlu1 %v2745_v45  ;;  %v3603_v45 = vld [vmem:[%s5104_s10 + $0x1] ss:$0 sm:$0xff] }
0x131a   :  { %4303 = vrot.lane.b32.xlu0 %v4855_v10, %s5150_s1 }
0x1328   :  { %4308 = vrot.lane.b32.xlu1 %v4855_v10, %s5151_s2  ;;  %v3564_v10 = vld [vmem:[%s5101_s7 + $0x30] sm:$0xff] }
0x135e   :  { %v2463_v8 = vpop.xlane.xlu0 %2462 }
0x1391   :  { %v2460_v9 = vpop.xlane.xlu0 %2459 }
0x1392   :  { %4384 = vrcp.f32 %v2460_v9 }
0x1393   :  { %4386 = vrcp.f32 %v2463_v8 }
0x1395   :  { %v4304_v11 = vpop.permute.xlu0 %4303 }
0x1396   :  { %v4306_v12 = vunpack.i.h.bf16 %v4304_v11  ;;  %v4305_v13 = vunpack.i.l.bf16 %v4304_v11 }
0x1398   :  { %v4147_v14 = vpack.c.bf16 %v4306_v12, %v4305_v13 }
0x139a   :  { %4148 = vmatprep.subr.bf16.mxu1 %v4147_v14 }
0x139c   :  { %v4385_v17 = vpop.eup %4384 }
0x139d   :  { %v4387_v21 = vpop.eup %4386  ;;  %v2466_v22 = vmul.f32 %v4385_v17, %v4379_v62  ;;  %v3614_v17 = vld [vmem:[%s5107_s13 + $0x50] sm:$0xff] }
0x139e   :  { %v2467_v25 = vmul.f32 %v4387_v21, %v4377_v55  ;;  %v3617_v21 = vld [vmem:[%s5107_s13 + $0x68] sm:$0xff] }
0x13a0   :  { %v2750_v15 = vpop.xlane.xlu1 %2749 }
0x13a4   :  { %v2747_v16 = vpop.xlane.xlu1 %2746 }
0x13a5   :  { %4388 = vrcp.f32 %v2747_v16 }
0x13a6   :  { %4390 = vrcp.f32 %v2750_v15  ;;  %v3613_v15 = vld [vmem:[%s5107_s13 + $0x48] sm:$0xff] }
0x13a7   :  { %v3938_v18 = vpop.f32.mrb[16].mxu1 }
0x13a8   :  { %v4309_v19 = vpop.permute.xlu1 %4308  ;;  %v2259_v20 = vpop.f32.mrb[17].mxu1 }
0x13a9   :  { %3941 = vmatprep.mubr.msk.f32.mxu1 %vm225_vm1, %v2259_v20  ;;  %v4311_v23 = vunpack.i.h.bf16 %v4309_v19  ;;  %v4310_v24 = vunpack.i.l.bf16 %v4309_v19  ;;  %v3616_v20 = vld [vmem:[%s5107_s13 + $0x60] sm:$0xff] }
0x13aa   :  { %3942 = vmatmul.mubr.msk.f32.vlgmr.msra.gmra.mrb[14].mxu1 %vm225_vm1, %v3938_v18  ;;  %v3615_v18 = vld [vmem:[%s5107_s13 + $0x58] sm:$0xff] }
0x13ab   :  { %4150 = vmatpush3.bf16.msra.mxu1 %v4147_v14  ;;  %3955 = vmatprep.mubr.msk.f32.mxu1 %vm313_vm3, %v2466_v22  ;;  %v4157_v26 = vpack.c.bf16 %v4311_v23, %v4310_v24  ;;  %v3612_v14 = vld [vmem:[%s5107_s13 + $0x40] sm:$0xff]  ;;  %v4173_v19 = vpack.c.bf16 %v3615_v18, %v3614_v17  ;;  %v4177_v22 = vpack.c.bf16 %v3617_v21, %v3616_v20  ;;  %v3619_v23 = vld [vmem:[%s5107_s13 + $0x78] sm:$0xff] }
0x13ac   :  { %3958 = vmatprep.subr.mxu1 %v3564_v10  ;;  %v4169_v16 = vpack.c.bf16 %v3613_v15, %v3612_v14  ;;  %v3626_v14 = vld [vmem:[%s5109_s15 + $0x1] ss:$0 sm:$0xff] }
0x13ad   :  { %v3627_v18 = vld [vmem:[%s5110_s16 + $0x1] ss:$0 sm:$0xff] }
0x13ae   :  { %3956 = vmatmul.mubr.msk.f32.vlgmr.msra.gmra.mrb[18].mxu1 %vm313_vm3, %v2467_v25  ;;  %v3609_v25 = vld [vmem:[%s5106_s12 + $0x1] ss:$0 sm:$0xff] }
0x13af   :  { %3959 = vmatpush3.msra.mxu1 %v3564_v10  ;;  %v4389_v27 = vpop.eup %4388  ;;  %v3618_v10 = vld [vmem:[%s5107_s13 + $0x70] sm:$0xff]  ;;  %s4470_s13 = smov [#allocation2]  }
0x13b0   :  { %4158 = vmatprep.subr.bf16.mxu1 %v4157_v26  ;;  %v4391_v28 = vpop.eup %4390  ;;  %v2753_v29 = vmul.f32 %v4389_v27, %v4383_v6  ;;  %v4181_v24 = vpack.c.bf16 %v3619_v23, %v3618_v10  ;;  %v3306_v10 = vld [vmem:[%s5111_s17 + $0x8] sm:$0xff] }
0x13b1   :  { %v2754_v31 = vmul.f32 %v4391_v28, %v4381_v0 }
0x1481   :  { %v3957_v35 = vpop.f32.mrb[18].mxu1 }
0x1482   :  { %v2546_v33 = vpop.f32.mrb[19].mxu1 }
0x1483   :  { %3960 = vmatprep.mubr.msk.f32.mxu1 %vm225_vm1, %v2546_v33 }
0x1484   :  { %3961 = vmatmul.mubr.msk.f32.vlgmr.msra.gmra.mrb[14].mxu1 %vm225_vm1, %v3957_v35 }
0x1485   :  { %4160 = vmatpush3.bf16.msra.mxu1 %v4157_v26  ;;  %3974 = vmatprep.mubr.msk.f32.mxu1 %vm313_vm3, %v2753_v29 }
0x1486   :  { %3977 = vmatprep.subr.mxu1 %v3565_v30 }
0x1488   :  { %3975 = vmatmul.mubr.msk.f32.vlgmr.msra.gmra.mrb[20].mxu1 %vm313_vm3, %v2754_v31 }
0x1489   :  { %3978 = vmatpush3.msra.mxu1 %v3565_v30 }
0x148a   :  { %4170 = vmatprep.subr.bf16.mxu1 %v4169_v16 }
0x155b   :  { %v3976_v32 = vpop.f32.mrb[20].mxu1 }
0x155c   :  { %v2833_v34 = vpop.f32.mrb[21].mxu1 }
0x155d   :  { %3979 = vmatprep.mubr.msk.f32.mxu1 %vm225_vm1, %v2833_v34 }
0x155e   :  { %3980 = vmatmul.mubr.msk.f32.vlgmr.msra.gmra.mrb[14].mxu1 %vm225_vm1, %v3976_v32 }
0x155f   :  { %4172 = vmatpush3.bf16.msra.mxu1 %v4169_v16 }
0x1560   :  { %4174 = vmatprep.subr.bf16.mxu1 %v4173_v19 }
0x1563   :  { %4176 = vmatpush3.bf16.msra.mxu1 %v4173_v19 }
0x1564   :  { %4178 = vmatprep.subr.bf16.mxu1 %v4177_v22 }
0x1567   :  { %4180 = vmatpush3.bf16.msra.mxu1 %v4177_v22  ;;  %v3305_v22 = vld [vmem:[%s5111_s17] sm:$0xff] }
0x1568   :  { %4182 = vmatprep.subr.bf16.mxu1 %v4181_v24 }
0x156b   :  { %4184 = vmatpush3.bf16.msra.mxu1 %v4181_v24  ;;  %v3231_v24 = vld [vmem:[%s5152_s4] sm:$0x3] }
0x1631   :  { %v3981_v37 = vpop.f32.mrb[14].mxu1 }
0x1632   :  { %v4202_v39 = vadd.f32 %v3981_v37, %v3575_v36  ;;  %v2914_v42 = vpop.f32.mrb[15].mxu1 }
0x1633   :  { %v4203_v43 = vadd.f32 %v3575_v36, %v2914_v42 }
0x1634   :  { %v2926_v44 = vadd.f32 %v4202_v39, %v4847_v5 }
0x1635   :  { %v2925_v52 = vadd.f32 %v4203_v43, %v4843_v3  ;;  %v3604_v3 = vld [vmem:[%s5105_s11 + $0x20] sm:$0xff] }
0x1636   :  { %v2934_v46 = vsel %vm76_vm0, %v2926_v44, 0.0  ;;  %v4161_v38 = vpack.c.bf16 %v3605_v58, %v3604_v3 }
0x1637   :  { %2935 = vadd.xlane.f32.xlu1 %v2934_v46  ;;  %v2931_v47 = vsel %vm76_vm0, %v2925_v52, 0.0 }
0x1638   :  { %2932 = vadd.xlane.f32.xlu0 %v2931_v47  ;;  %4162 = vmatprep.subr.bf16.mxu0 %v4161_v38 }
0x1639   :  { %4164 = vmatpush3.bf16.msra.mxu0 %v4161_v38 }
0x163a   :  { %4166 = vmatprep.subr.bf16.mxu0 %v4165_v61 }
0x163d   :  { %4168 = vmatpush3.bf16.msra.mxu0 %v4165_v61 }
0x16c4   :  { %v2936_v48 = vpop.xlane.xlu1 %2935 }
0x16c5   :  { %v2938_v50 = vmul.f32 0.03125, %v2936_v48  ;;  %v2933_v51 = vpop.xlane.xlu0 %2932 }
0x16c6   :  { %v2937_v53 = vmul.f32 0.03125, %v2933_v51 }
0x16c7   :  { %v2940_v54 = vsub.f32 %v2926_v44, %v2938_v50 }
0x16c8   :  { %v2939_v55 = vsub.f32 %v2925_v52, %v2937_v53  ;;  %v3621_v53 = vld [vmem:[%s5108_s14 + $0x1] ss:$0 sm:$0xff]  ;;  %s3484_s14 = sshll.u32 %s4470_s13, 4  ;;  %s3485_s14 = int_to_ptr.vmem [resolvable:$true] %s3484_s14 }
0x16c9   :  { %v2942_v40 = vmul.f32 %v2940_v54, %v2940_v54  ;;  %p4413_p1 = scmp.lt.s32.totalorder %s3485_s14, %s3485_s14 }
0x16ca   :  { %v2941_v56 = vmul.f32 %v2939_v55, %v2939_v55 }
0x16cb   :  { %v2946_v5 = vsel %vm76_vm0, %v2942_v40, 0.0 }
0x16cc   :  { %v2943_v57 = vsel %vm76_vm0, %v2941_v56, 0.0 }
0x16cd   :  { %2944 = vadd.xlane.f32.xlu0 %v2943_v57 }
0x16d1   :  { %2947 = vadd.xlane.f32.xlu0 %v2946_v5 }
0x175a   :  { %v2945_v62 = vpop.xlane.xlu0 %2944 }
0x175b   :  { %v2949_v63 = vmul.f32 0.03125, %v2945_v62 }
0x175d   :  { %v2951_v1 = vadd.f32 1e-12, %v2949_v63 }
0x175e   :  { %v2948_v2 = vpop.xlane.xlu0 %2947 }
0x175f   :  { %4392 = vrsqrt.f32 %v2951_v1  ;;  %v2950_v49 = vmul.f32 0.03125, %v2948_v2 }
0x1761   :  { %v2952_v4 = vadd.f32 1e-12, %v2950_v49 }
0x1763   :  { %4394 = vrsqrt.f32 %v2952_v4 }
0x1769   :  { %v4393_v0 = vpop.eup %4392 }
0x176a   :  { %v2955_v6 = vmul.f32 %v4393_v0, %v2939_v55  ;;  %v4467_v0 = vmov 0.0|0.0  }
0x176b   :  { %4185 = vmatprep.subr.bf16.mxu0 %v4467_v0  ;;  %4194 = vmatprep.subr.bf16.mxu1 %v4467_v0 }
0x176c   :  { %v2963_v7 = vmul.f32 %v3602_v41, %v2955_v6 }
0x176d   :  { %v4395_v8 = vpop.eup %4394 }
0x176e   :  { %v2956_v9 = vmul.f32 %v4395_v8, %v2940_v54  ;;  %v2971_v11 = vadd.f32 %v3603_v45, %v2963_v7 }
0x1770   :  { %v2964_v12 = vmul.f32 %v3602_v41, %v2956_v9  ;;  %3990 = vmatprep.mubr.msk.f32.mxu0 %vm76_vm0, %v2971_v11  ;;  %v4469_v41 = vmov 0.0  }
0x1772   :  { %v2972_v13 = vadd.f32 %v3603_v45, %v2964_v12 }
0x1774   :  { %3991 = vmatmul.mubr.msk.f32.vlgmr.msra.gmra.mrb[22].mxu0 %vm76_vm0, %v2972_v13 }
0x1775   :  { %4016 = vmatprep.mubr.msk.f32.mxu0 %vm4468_vm5, %v4469_v41 }
0x1847   :  { %v3992_v26 = vpop.f32.mrb[22].mxu0 }
0x1848   :  { %v3064_v27 = vadd.f32 %v3992_v26, %v3609_v25  ;;  %v3058_v35 = vpop.f32.mrb[23].mxu0  ;;  %v3307_v26 = vld [vmem:[%s5111_s17 + $0x10] sm:$0xff] }
0x1849   :  { %v3059_v33 = vadd.f32 %v3609_v25, %v3058_v35  ;;  %v4189_v25 = vpack.c.bf16 %v3306_v10, %v3305_v22 }
0x184a   :  { %v3068_v28 = vmul.f32 %v3064_v27, %v3064_v27 }
0x184b   :  { %v3067_v29 = vmul.f32 %v3059_v33, %v3059_v33 }
0x184c   :  { %v3070_v30 = vmul.f32 %v3068_v28, %v3064_v27 }
0x184d   :  { %v3069_v31 = vmul.f32 %v3067_v29, %v3059_v33  ;;  %v3390_v29 = vld [vmem:[%s5113_s19] sm:$0xff] }
0x184e   :  { %v3072_v32 = vmul.f32 0.044715, %v3070_v30  ;;  %v3391_v30 = vld [vmem:[%s5113_s19 + $0x8] sm:$0xff] }
0x184f   :  { %v3071_v34 = vmul.f32 0.044715, %v3069_v31  ;;  %v3392_v31 = vld [vmem:[%s5113_s19 + $0x10] sm:$0xff] }
0x1850   :  { %v3074_v36 = vadd.f32 %v3072_v32, %v3064_v27  ;;  %v4195_v32 = vpack.c.bf16 %v3391_v30, %v3390_v29 }
0x1851   :  { %v3073_v37 = vadd.f32 %v3071_v34, %v3059_v33  ;;  %v3393_v34 = vld [vmem:[%s5113_s19 + $0x18] sm:$0xff]  ;;  %s4408_s19 = scalar_lea.vmem %s3485_s14, 32 }
0x1852   :  { %v3076_v39 = vmul.f32 0.7978846, %v3074_v36  ;;  %v4198_v36 = vpack.c.bf16 %v3393_v34, %v3392_v31  ;;  %p4409_p0 = scmp.ne.s32.totalorder %s3485_s14, %s4408_s19  ;;  %p4414_p2 = scmp.lt.s32.totalorder %s4408_s19, %s4408_s19 }
0x1853   :  { %v3075_v42 = vmul.f32 0.7978846, %v3073_v37  ;;  %v3629_v37 = vld [vmem:[%s5112_s18] ss:$0 sm:$0xff] }
0x1854   :  { %4396 = vtanh.f32 %v3076_v39  ;;  %p4415_p3 = por %p4414_p2, %p4413_p1 }
0x1855   :  { %4398 = vtanh.f32 %v3075_v42 }
0x1856   :  { %p4416_p4 = pnand %p4415_p3, %p4409_p0 }
0x185e   :  { %v4397_v43 = vpop.eup %4396 }
0x185f   :  { %v4399_v44 = vpop.eup %4398  ;;  %v3080_v52 = vadd.f32 1.0, %v4397_v43 }
0x1860   :  { %v3079_v46 = vadd.f32 1.0, %v4399_v44 }
0x1861   :  { %v3082_v47 = vmul.f32 0.5, %v3080_v52 }
0x1862   :  { %v3081_v48 = vmul.f32 0.5, %v3079_v46 }
0x1863   :  { %v3084_v51 = vmul.f32 %v3082_v47, %v3064_v27  ;;  %v3308_v27 = vld [vmem:[%s5111_s17 + $0x18] sm:$0xff] }
0x1864   :  { %v3083_v50 = vmul.f32 %v3081_v48, %v3059_v33  ;;  %v4192_v35 = vpack.c.bf16 %v3308_v27, %v3307_v26 }
0x1866   :  { %4009 = vmatprep.mubr.msk.f32.mxu1 %vm1544_vm4, %v3083_v50 }
0x1867   :  { %4010 = vmatmul.mubr.msk.f32.vlgmr.msra.gmra.mrb[22].mxu1 %vm1544_vm4, %v3084_v51 }
0x1868   :  { %4038 = vmatprep.mubr.msk.f32.mxu1 %vm4468_vm5, %v4469_v41  ;;  %4196 = vmatpush3.bf16.msra.mxu1 %v4195_v32 }
0x1869   :  { %4197 = vmatprep.subr.bf16.mxu1 %v4467_v0 }
0x186c   :  { %4199 = vmatpush3.bf16.msra.mxu1 %v4198_v36 }
0x193a   :  { %v4011_v54 = vpop.f32.mrb[22].mxu1 }
0x193b   :  { %v3174_v55 = vpop.f32.mrb[23].mxu1  ;;  %v3180_v56 = vadd.f32 %v4011_v54, %v3621_v53 }
0x193c   :  { %v3175_v57 = vadd.f32 %v3621_v53, %v3174_v55 }
0x193d   :  { %v3184_v3 = vadd.f32 %v3180_v56, %v2972_v13 }
0x193e   :  { %v3183_v40 = vadd.f32 %v3175_v57, %v2971_v11 }
0x193f   :  { %v3192_v58 = vsel %vm76_vm0, %v3184_v3, 0.0 }
0x1940   :  { %v3189_v5 = vsel %vm76_vm0, %v3183_v40, 0.0 }
0x1941   :  { %3190 = vadd.xlane.f32.xlu0 %v3189_v5 }
0x1945   :  { %3193 = vadd.xlane.f32.xlu0 %v3192_v58 }
0x19ce   :  { %v3191_v38 = vpop.xlane.xlu0 %3190 }
0x19cf   :  { %v3195_v59 = vmul.f32 0.03125, %v3191_v38 }
0x19d1   :  { %v3197_v60 = vsub.f32 %v3183_v40, %v3195_v59 }
0x19d2   :  { %v3194_v61 = vpop.xlane.xlu0 %3193 }
0x19d3   :  { %v3196_v62 = vmul.f32 0.03125, %v3194_v61  ;;  %v3199_v63 = vmul.f32 %v3197_v60, %v3197_v60 }
0x19d5   :  { %v3198_v1 = vsub.f32 %v3184_v3, %v3196_v62  ;;  %v3201_v2 = vsel %vm76_vm0, %v3199_v63, 0.0 }
0x19d6   :  { %3202 = vadd.xlane.f32.xlu0 %v3201_v2 }
0x19d7   :  { %v3200_v49 = vmul.f32 %v3198_v1, %v3198_v1 }
0x19d9   :  { %v3204_v4 = vsel %vm76_vm0, %v3200_v49, 0.0 }
0x19da   :  { %3205 = vadd.xlane.f32.xlu1 %v3204_v4 }
0x1a63   :  { %v3203_v6 = vpop.xlane.xlu0 %3202 }
0x1a64   :  { %v3207_v45 = vmul.f32 0.03125, %v3203_v6 }
0x1a66   :  { %v3209_v7 = vadd.f32 1e-12, %v3207_v45 }
0x1a67   :  { %v3206_v8 = vpop.xlane.xlu1 %3205 }
0x1a68   :  { %4400 = vrsqrt.f32 %v3209_v7  ;;  %v3208_v9 = vmul.f32 0.03125, %v3206_v8 }
0x1a6a   :  { %v3210_v11 = vadd.f32 1e-12, %v3208_v9 }
0x1a6c   :  { %4402 = vrsqrt.f32 %v3210_v11 }
0x1a72   :  { %v4401_v12 = vpop.eup %4400 }
0x1a73   :  { %v3213_v13 = vmul.f32 %v4401_v12, %v3197_v60 }
0x1a75   :  { %v3221_v17 = vmul.f32 %v3626_v14, %v3213_v13 }
0x1a76   :  { %v4403_v15 = vpop.eup %4402 }
0x1a77   :  { %v3214_v16 = vmul.f32 %v4403_v15, %v3198_v1  ;;  %v3229_v20 = vadd.f32 %v3627_v18, %v3221_v17 }
0x1a79   :  { %v3222_v19 = vmul.f32 %v3626_v14, %v3214_v16 }
0x1a7b   :  { %v3230_v21 = vadd.f32 %v3627_v18, %v3222_v19 }
0x1a7d   :  { %v4186_v23 = vpack.c.bf16 %v3230_v21, %v3229_v20 }
0x1a7f   :  { %4187 = vmatpush3.bf16.msra.mxu0 %v4186_v23 }
0x1a80   :  { %4188 = vmatprep.subr.bf16.mxu0 %v4467_v0 }
0x1a82   :  { %4017 = vmatmul.mubr.msk.f32.vlgmr.msra.gmra.mrb[24].mxu0 %vm313_vm3, %v3231_v24 }
0x1a83   :  { %4190 = vmatpush3.bf16.msra.mxu0 %v4189_v25  ;;  %4027 = vmatprep.mubr.msk.f32.mxu0 %vm4468_vm5, %v4469_v41 }
0x1a84   :  { %4191 = vmatprep.subr.bf16.mxu0 %v4467_v0 }
0x1a87   :  { %4193 = vmatpush3.bf16.msra.mxu0 %v4192_v35 }
0x1b55   :  { %v3301_v33 = vpop.f32.mrb[24].mxu0 }
0x1b56   :  { %v4018_v28 = vpop.f32.mrb[25].mxu0  ;;  %4028 = vmatmul.mubr.msk.f32.vlgmr.msra.gmra.mrb[26].mxu0 %vm76_vm0, %v3301_v33 }
0x1c29   :  { %v3385_v39 = vpop.f32.mrb[26].mxu0 }
0x1c2a   :  { %v3386_v42 = vadd.f32 %v3629_v37, %v3385_v39  ;;  %v4029_v43 = vpop.f32.mrb[27].mxu0 }
0x1c2c   :  { %4404 = vtanh.f32 %v3386_v42 }
0x1c36   :  { %v4405_v44 = vpop.eup %4404 }
0x1c37   :  { %4039 = vmatmul.mubr.msk.f32.vlgmr.msra.gmra.mrb[24].mxu1 %vm76_vm0, %v4405_v44  ;;  %3475 = vst.msk [vmem:[#allocation2] sm:$0x3] %vm3474_vm6, %v4405_v44 }
0x1c38   :  { %4419 = shalt.err (!%p4416_p4)
}
0x1c39   :  { %s4420_s5 = scalar_lea.hbm %s5115_s21, 32 }
0x1c3a   :  { %p4421_p5 = scmp.ne.s32.totalorder %s5115_s21, %s4420_s5  ;;  %p4424_p6 = scmp.lt.u32.totalorder %s4420_s5, %s5115_s21 }
0x1c3c   :  { %p4426_p7 = pnand %p4424_p6, %p4421_p5 }
0x1c3e   :  { %4429 = shalt.err (!%p4426_p7)
}
0x1c3f   :  { %3487 = dma.vmem_to_hbm [thread:$0]  %s3485_s14, 32, %s5115_s21, [#allocation3]   ;;  %v3631_v52 = vld [vmem:[%s5114_s20] ss:$0 sm:$0xff]  ;;  %vm3476_vm7 = vcmask 25600  }
0x1c40   :  { %s4471_s16 = smov [#allocation4]  }
0x1c41   :  { %s3494_s27 = sshll.u32 %s4471_s16, 4  ;;  %s3495_s27 = int_to_ptr.vmem [resolvable:$true] %s3494_s27 }
0x1c42   :  { %s4430_s7 = scalar_lea.vmem %s3495_s27, 32  ;;  %p4435_p9 = scmp.lt.s32.totalorder %s3495_s27, %s3495_s27 }
0x1c43   :  { %p4431_p8 = scmp.ne.s32.totalorder %s3495_s27, %s4430_s7  ;;  %p4436_p10 = scmp.lt.s32.totalorder %s4430_s7, %s4430_s7 }
0x1c45   :  { %p4437_p11 = por %p4436_p10, %p4435_p9 }
0x1c47   :  { %p4438_p12 = pnand %p4437_p11, %p4431_p8 }
0x1d0a   :  { %v3470_v46 = vpop.f32.mrb[24].mxu1 }
0x1d0b   :  { %v3471_v47 = vadd.f32 %v3631_v52, %v3470_v46  ;;  %v4040_v48 = vpop.f32.mrb[25].mxu1 }
0x1d0d   :  { %3477 = vst.msk [vmem:[#allocation4] sm:$0x3] %vm3476_vm7, %v3471_v47 }
0x1d0e   :  { %4441 = shalt.err (!%p4438_p12)
}
0x1d0f   :  { %s4442_s23 = scalar_lea.hbm %s5116_s22, 32 }
0x1d10   :  { %p4443_p13 = scmp.ne.s32.totalorder %s5116_s22, %s4442_s23  ;;  %p4446_p0 = scmp.lt.u32.totalorder %s4442_s23, %s5116_s22 }
0x1d12   :  { %p4448_p1 = pnand %p4446_p0, %p4443_p13 }
0x1d14   :  { %4451 = shalt.err (!%p4448_p1)
}
0x1d15   :  { %3497 = dma.vmem_to_hbm [thread:$0]  %s3495_s27, 32, %s5116_s22, [#allocation5]  }
0x1d16   :  { %4452 = dma.done.wait [#allocation3], 32  }
0x1d17   :  { %4453 = vsyncadd [#allocation3], 4294967264 }
0x1d18   :  { %4454 = dma.done.wait [#allocation5], 32  }
0x1d19   :  { %4455 = vsyncadd [#allocation5], 4294967264 }
0x1d1a   :  { %3504 = vsyncpa [#allocation3], 1 }
0x1d1b   :  { %3505 = vsyncpa [#allocation5], 1 }

</bundles_post_ra>
